<compile_context>
chip_gen: v7x
topology: tpu7x:2x2x1
jax: 0.10.0
libtpu: 0.0.40
codegen_flags: <defaults>
</compile_context>

<pallas_src>
import functools

import jax
import jax.numpy as jnp
from jax.experimental import pallas as pl
from jax.experimental.pallas import tpu as pltpu


# --------------------------------------------------------------------------
# Fused Pallas kernel
# --------------------------------------------------------------------------
def _deepconvnet_kernel(x_ref, w1_ref, s1_ref, t1_ref, w2_ref, s2_ref, t2_ref,
                        w3_ref, s3_ref, t3_ref, wfc_ref, bfc_ref, out_ref,
                        a1_ref, a2_ref, a3_ref, *, bt, pooled_lens):
    """Fused DeepConvNet forward for one batch tile of `bt` samples.

    x_ref  : (bt*Lp0, C_in) f32  time on sublanes, channels on lanes; each sample
                                 occupies an 8-row-aligned segment of Lp0 rows.
    w*_ref : (5*C_in, C_out) bf16  im2col conv weights per block.
    s*/t*  : (1, C_out) f32      folded BatchNorm scale / shift (incl. conv bias).
    wfc_ref: (L3, C3, nc) bf16   FC weights, rows permuted for channel-major flatten.
    bfc_ref: (1, nc) f32         FC bias.
    out_ref: (1, bt, nc) f32     logits for this batch tile.
    a*_ref : (bt*Lp_k, C_k) f32  VMEM scratch holding each block's pooled output.
    """
    c_in = x_ref.shape[1]
    kw = w1_ref.shape[0] // c_in          # temporal taps (= 5)
    l1, l2, l3 = pooled_lens              # pooled time length per sample, per block

    def conv_bn_elu_pool(src_ref, w_ref, scale_ref, shift_ref, dst_ref, l_pool):
        seg_in = src_ref.shape[0] // bt   # padded per-sample rows in the input
        seg_out = dst_ref.shape[0] // bt  # padded per-sample rows in the output
        w_mat = w_ref[...]                # (kw*C_in, C_out) bf16 -- loaded once
        scale = scale_ref[...]            # (1, C_out) f32
        shift = shift_ref[...]

        def act_at(base):
            # im2col rows for conv output positions base, base+2, ... within one
            # sample: concatenate the kw strided slices along lanes, then a single
            # MXU matmul with contraction dim kw*C_in.  All slice starts/strides
            # are Python-static, so these lower to plain strided vector loads.
            taps = [src_ref[pl.ds(base + w, l_pool, stride=2), :]
                    for w in range(kw)]
            rows = jnp.concatenate(taps, axis=-1).astype(jnp.bfloat16)
            z = jnp.dot(rows, w_mat, preferred_element_type=jnp.float32)
            z = z * scale + shift                         # folded BatchNorm (+bias)
            # ELU(alpha=1); clamp the exp argument so the untaken branch never
            # produces inf/NaN garbage.
            return jnp.where(z > 0, z, jnp.exp(jnp.minimum(z, 0.0)) - 1.0)

        for b in range(bt):
            # MaxPool((1,2),stride 2) == max of conv activations at even/odd
            # positions, computed on vreg-resident values (no pre-pool store).
            pooled = jnp.maximum(act_at(b * seg_in), act_at(b * seg_in + 1))
            dst_ref[pl.ds(b * seg_out, l_pool), :] = pooled

    conv_bn_elu_pool(x_ref, w1_ref, s1_ref, t1_ref, a1_ref, l1)
    conv_bn_elu_pool(a1_ref, w2_ref, s2_ref, t2_ref, a2_ref, l2)
    conv_bn_elu_pool(a2_ref, w3_ref, s3_ref, t3_ref, a3_ref, l3)

    # Classifier (fused): logits[b] = bias + sum_l pooled3[b, l, :] @ Wfc[l],
    # with torch's channel-major flatten folded into the Wfc row permutation.
    seg3 = a3_ref.shape[0] // bt
    nc = out_ref.shape[2]
    logits = jnp.zeros((bt, nc), jnp.float32)
    for l in range(l3):
        feats = a3_ref[pl.ds(l, bt, stride=seg3), :].astype(jnp.bfloat16)  # (bt, C3)
        logits = logits + jnp.dot(feats, wfc_ref[l],
                                  preferred_element_type=jnp.float32)
    out_ref[0] = logits + bfc_ref[...]


# --------------------------------------------------------------------------
# Wrapper
# --------------------------------------------------------------------------
def _round_up(n, m=8):
    return ((n + m - 1) // m) * m


def _pick_batch_tile(batch):
    """Largest divisor of `batch` <= 8 that still leaves >= 2 grid steps
    (so both TensorCores get work); otherwise the largest divisor <= 8."""
    divisors = [d for d in range(1, batch + 1) if batch % d == 0 and d <= 8]
    multi = [d for d in divisors if batch // d >= 2]
    return max(multi) if multi else max(divisors)


def deepconvnet_forward_pallas(x, w1, s1, t1, w2, s2, t2, w3, s3, t3, wfc, bfc):
    """x: (B, L, C_in) f32, time-major.  Returns logits (B, num_classes) f32."""
    batch, l_in, c_in = x.shape
    c1, c2, c3 = w1.shape[1], w2.shape[1], w3.shape[1]
    nc = wfc.shape[2]
    l1 = (l_in - 5 + 1) // 2
    l2 = (l1 - 5 + 1) // 2
    l3 = (l2 - 5 + 1) // 2
    assert wfc.shape[0] == l3 and wfc.shape[1] == c3

    bt = _pick_batch_tile(batch)
    grid = batch // bt

    # Pad each sample's time axis to an 8-row-aligned segment so per-sample
    # scratch stores start on sublane-tile boundaries (padding is never read).
    lp0, lp1, lp2, lp3 = (_round_up(n) for n in (l_in, l1, l2, l3))
    if lp0 != l_in:
        x = jnp.pad(x, ((0, 0), (0, lp0 - l_in), (0, 0)))
    x2d = x.reshape(batch * lp0, c_in)

    def replicated(shape):
        nd = len(shape)
        return pl.BlockSpec(shape, lambda i, _nd=nd: (0,) * _nd)

    kernel = functools.partial(_deepconvnet_kernel, bt=bt, pooled_lens=(l1, l2, l3))

    out = pl.pallas_call(
        kernel,
        out_shape=jax.ShapeDtypeStruct((grid, bt, nc), jnp.float32),
        grid_spec=pltpu.PrefetchScalarGridSpec(
            num_scalar_prefetch=0,
            grid=(grid,),
            in_specs=[
                pl.BlockSpec((bt * lp0, c_in), lambda i: (i, 0)),
                replicated(w1.shape), replicated(s1.shape), replicated(t1.shape),
                replicated(w2.shape), replicated(s2.shape), replicated(t2.shape),
                replicated(w3.shape), replicated(s3.shape), replicated(t3.shape),
                replicated(wfc.shape), replicated(bfc.shape),
            ],
            out_specs=pl.BlockSpec((1, bt, nc), lambda i: (i, 0, 0)),
            scratch_shapes=[
                pltpu.VMEM((bt * lp1, c1), jnp.float32),
                pltpu.VMEM((bt * lp2, c2), jnp.float32),
                pltpu.VMEM((bt * lp3, c3), jnp.float32),
            ],
        ),
        compiler_params=pltpu.CompilerParams(
            dimension_semantics=("parallel",)),
    )(x2d, w1, s1, t1, w2, s2, t2, w3, s3, t3, wfc, bfc)
    return out.reshape(batch, nc)


# --------------------------------------------------------------------------
# Parameter preparation (BN folding, conv fusion, im2col / FC layout)
# --------------------------------------------------------------------------
def fold_bn(gamma, beta, mean, var, conv_bias, eps=1e-5):
    scale = gamma / jnp.sqrt(var + eps)
    shift = (conv_bias - mean) * scale + beta
    return scale[None, :].astype(jnp.float32), shift[None, :].astype(jnp.float32)


def prepare_kernel_params(p):
    k = p["conv1_w"].shape[0]
    node = p["conv2_w"].shape[2]

    # Block1: fuse temporal Conv2d(1,K,(1,5)) with spatial Conv2d(K,K,(node,1)).
    w1_t = p["conv1_w"][:, 0, 0, :]                      # (K, 5)
    w1_s = p["conv2_w"][:, :, :, 0]                      # (K_out, K_in, node)
    w1_eff = jnp.einsum("kw,okn->wno", w1_t, w1_s)       # (5, node, K)
    b1_eff = jnp.einsum("okn,k->o", w1_s, p["conv1_b"])  # (K,)
    w1_mat = w1_eff.reshape(5 * node, k).astype(jnp.bfloat16)
    s1, t1 = fold_bn(p["bn1_g"], p["bn1_b"], p["bn1_m"], p["bn1_v"], b1_eff)

    def conv_mat(w):   # (C_out, C_in, 1, 5) -> (5*C_in, C_out) im2col weight
        c_out, c_in = w.shape[0], w.shape[1]
        return (jnp.transpose(w[:, :, 0, :], (2, 1, 0))
                .reshape(5 * c_in, c_out).astype(jnp.bfloat16))

    w2_mat = conv_mat(p["conv3_w"])
    s2, t2 = fold_bn(p["bn2_g"], p["bn2_b"], p["bn2_m"], p["bn2_v"], p["conv3_b"])
    w3_mat = conv_mat(p["conv4_w"])
    s3, t3 = fold_bn(p["bn3_g"], p["bn3_b"], p["bn3_m"], p["bn3_v"], p["conv4_b"])

    # Classifier: fold the channel-major torch.flatten of (B, C3, 1, L3) into a
    # row permutation of the FC weight (so activations are never transposed).
    nc, hidden = p["fc_w"].shape
    c3 = p["conv4_w"].shape[0]
    l3 = hidden // c3
    wfc = jnp.transpose(p["fc_w"].reshape(nc, c3, l3), (2, 1, 0)).astype(jnp.bfloat16)
    bfc = p["fc_b"][None, :].astype(jnp.float32)
    return (w1_mat, s1, t1, w2_mat, s2, t2, w3_mat, s3, t3, wfc, bfc)


def cross_entropy_loss(logits, labels, class_weight, label_smoothing=0.0):
    """Matches nn.CrossEntropyLoss(label_smoothing=ls, weight=w), mean reduction."""
    num_classes = logits.shape[-1]
    logp = jax.nn.log_softmax(logits, axis=-1)
    onehot = jax.nn.one_hot(labels, num_classes, dtype=logits.dtype)
    q = (1.0 - label_smoothing) * onehot + label_smoothing / num_classes
    per_sample = -(q * logp).sum(axis=-1)
    w = class_weight[labels]
    return (w * per_sample).sum() / w.sum()


# --------------------------------------------------------------------------
# Model
# --------------------------------------------------------------------------
def init_params(key, node_size, time_series_size, num_classes, num_kernels):
    n, k = node_size, num_kernels
    keys = iter(jax.random.split(key, 24))

    def nrm(shape, s=0.1):
        return s * jax.random.normal(next(keys), shape, jnp.float32)

    def pos(shape):
        return jax.random.uniform(next(keys), shape, jnp.float32, 0.5, 1.5)

    h1 = (time_series_size - 5 + 1 - 2) // 2 + 1
    h2 = (h1 - 5 + 1 - 2) // 2 + 1
    h3 = (h2 - 5 + 1 - 2) // 2 + 1
    hidden = h3 * 4 * k

    return {
        # Block1: Conv2d(1,K,(1,5)) + Conv2d(K,K,(node,1),bias=False) + BN(K)
        "conv1_w": nrm((k, 1, 1, 5)), "conv1_b": nrm((k,)),
        "conv2_w": nrm((k, k, n, 1)),
        "bn1_g": pos((k,)), "bn1_b": nrm((k,)), "bn1_m": nrm((k,)), "bn1_v": pos((k,)),
        # Block2: Conv2d(K,2K,(1,5)) + BN(2K)
        "conv3_w": nrm((2 * k, k, 1, 5)), "conv3_b": nrm((2 * k,)),
        "bn2_g": pos((2 * k,)), "bn2_b": nrm((2 * k,)),
        "bn2_m": nrm((2 * k,)), "bn2_v": pos((2 * k,)),
        # Block3: Conv2d(2K,4K,(1,5)) + BN(4K)
        "conv4_w": nrm((4 * k, 2 * k, 1, 5)), "conv4_b": nrm((4 * k,)),
        "bn3_g": pos((4 * k,)), "bn3_b": nrm((4 * k,)),
        "bn3_m": nrm((4 * k,)), "bn3_v": pos((4 * k,)),
        # Classifier (PyTorch Linear layout: (out, in))
        "fc_w": nrm((num_classes, hidden)), "fc_b": nrm((num_classes,)),
    }


@jax.jit
def deep_conv_net_forward(params, time_series, labels, class_weight):
    """time_series: (B, node, time) f32; labels: (B,) int32."""
    kp = prepare_kernel_params(params)
    # NCHW (B,1,node,time) -> kernel layout (B, time, node)
    x = jnp.transpose(time_series, (0, 2, 1)).astype(jnp.float32)
    logits = deepconvnet_forward_pallas(x, *kp)
    # TODO(synk): BaseConfig defaults assumed: label_smoothing=0.0, class_weight given.
    loss = cross_entropy_loss(logits, labels, class_weight, label_smoothing=0.0)
    return logits, loss


# --------------------------------------------------------------------------
# Pure-JAX reference (eval-mode forward), for correctness checking
# --------------------------------------------------------------------------
def reference_forward(params, time_series, labels, class_weight, eps=1e-5):
    p = params
    x = time_series[:, None, :, :].astype(jnp.float32)   # (B, 1, node, T)

    def conv(h, w, b=None):
        y = jax.lax.conv_general_dilated(
            h, w, window_strides=(1, 1), padding="VALID",
            dimension_numbers=("NCHW", "OIHW", "NCHW"))
        if b is not None:
            y = y + b[None, :, None, None]
        return y

    def bn(h, g, b, m, v):
        return (h - m[None, :, None, None]) * (
            g[None, :, None, None] / jnp.sqrt(v[None, :, None, None] + eps)
        ) + b[None, :, None, None]

    def elu(h):
        return jnp.where(h > 0, h, jnp.exp(h) - 1.0)

    def pool(h):
        n = (h.shape[-1] - 2) // 2 + 1
        return jnp.maximum(h[..., 0:2 * n:2], h[..., 1:2 * n:2])

    h = conv(x, p["conv1_w"], p["conv1_b"])
    h = conv(h, p["conv2_w"])
    h = pool(elu(bn(h, p["bn1_g"], p["bn1_b"], p["bn1_m"], p["bn1_v"])))
    h = conv(h, p["conv3_w"], p["conv3_b"])
    h = pool(elu(bn(h, p["bn2_g"], p["bn2_b"], p["bn2_m"], p["bn2_v"])))
    h = conv(h, p["conv4_w"], p["conv4_b"])
    h = pool(elu(bn(h, p["bn3_g"], p["bn3_b"], p["bn3_m"], p["bn3_v"])))
    feats = h.reshape(h.shape[0], -1)                    # channel-major flatten
    logits = feats @ p["fc_w"].T + p["fc_b"][None, :]
    loss = cross_entropy_loss(logits, labels, class_weight)
    return logits, loss


# --------------------------------------------------------------------------
# Main
# --------------------------------------------------------------------------
if __name__ == "__main__":
    node_size = 8
    time_series_size = 64
    num_classes = 3
    num_kernels = 8

    key = jax.random.PRNGKey(0)
    k_param, k_x, k_y = jax.random.split(key, 3)
    params = init_params(k_param, node_size, time_series_size, num_classes, num_kernels)
    class_weight = jnp.ones((num_classes,), jnp.float32)
    ref_fn = jax.jit(reference_forward)

    # batch=2 -> batch_tile=1, grid=2 (both TensorCores busy);
    # batch=8 -> batch_tile=4, grid=2 (exercises multi-sample batch tiles).
    for batch in (2, 8):
        kx = jax.random.fold_in(k_x, batch)
        ky = jax.random.fold_in(k_y, batch)
        time_series = jax.random.normal(
            kx, (batch, node_size, time_series_size), jnp.float32)
        labels = jax.random.randint(ky, (batch,), 0, num_classes, jnp.int32)

        logits, loss = deep_conv_net_forward(params, time_series, labels, class_weight)
        jax.block_until_ready((logits, loss))

        assert logits.shape == (batch, num_classes)
        assert loss.shape == ()
        assert bool(jnp.all(jnp.isfinite(logits))) and bool(jnp.isfinite(loss))

        ref_logits, ref_loss = ref_fn(params, time_series, labels, class_weight)
        jax.block_until_ready((ref_logits, ref_loss))
        max_err = float(jnp.max(jnp.abs(logits - ref_logits)))
        assert max_err < 5e-2, f"logits mismatch vs reference: max abs err {max_err}"
        assert abs(float(loss) - float(ref_loss)) < 5e-2, "loss mismatch vs reference"

    print("KERNEL_OK")
</pallas_src>

<mosaic_0001>
module attributes {stable_mosaic.version = 11 : i64} {
  func.func @_deepconvnet_kernel(%arg0: i32, %arg1: memref<64x8xf32, #tpu.memory_space<vmem>>, %arg2: memref<40x8xbf16, #tpu.memory_space<vmem>>, %arg3: memref<1x8xf32, #tpu.memory_space<vmem>>, %arg4: memref<1x8xf32, #tpu.memory_space<vmem>>, %arg5: memref<40x16xbf16, #tpu.memory_space<vmem>>, %arg6: memref<1x16xf32, #tpu.memory_space<vmem>>, %arg7: memref<1x16xf32, #tpu.memory_space<vmem>>, %arg8: memref<80x32xbf16, #tpu.memory_space<vmem>>, %arg9: memref<1x32xf32, #tpu.memory_space<vmem>>, %arg10: memref<1x32xf32, #tpu.memory_space<vmem>>, %arg11: memref<4x32x3xbf16, #tpu.memory_space<vmem>>, %arg12: memref<1x3xf32, #tpu.memory_space<vmem>>, %arg13: memref<1x1x3xf32, #tpu.memory_space<vmem>>, %arg14: memref<32x8xf32, #tpu.memory_space<vmem>>, %arg15: memref<16x16xf32, #tpu.memory_space<vmem>>, %arg16: memref<8x32xf32, #tpu.memory_space<vmem>>) attributes {dimension_semantics = [#tpu.dimension_semantics<parallel>], iteration_bounds = array<i64: 2>, scalar_prefetch = 0 : i64, scratch_operands = 3 : i64, tpu.core_type = #tpu.core_type<tc>, window_params = [{transform_indices = @transform_0, window_bounds = array<i64: 64, 8>}, {pipeline_mode = #tpu.pipeline_mode<synchronous>, transform_indices = @transform_1, window_bounds = array<i64: 40, 8>}, {pipeline_mode = #tpu.pipeline_mode<synchronous>, transform_indices = @transform_2, window_bounds = array<i64: 1, 8>}, {pipeline_mode = #tpu.pipeline_mode<synchronous>, transform_indices = @transform_3, window_bounds = array<i64: 1, 8>}, {pipeline_mode = #tpu.pipeline_mode<synchronous>, transform_indices = @transform_4, window_bounds = array<i64: 40, 16>}, {pipeline_mode = #tpu.pipeline_mode<synchronous>, transform_indices = @transform_5, window_bounds = array<i64: 1, 16>}, {pipeline_mode = #tpu.pipeline_mode<synchronous>, transform_indices = @transform_6, window_bounds = array<i64: 1, 16>}, {pipeline_mode = #tpu.pipeline_mode<synchronous>, transform_indices = @transform_7, window_bounds = array<i64: 80, 32>}, {pipeline_mode = #tpu.pipeline_mode<synchronous>, transform_indices = @transform_8, window_bounds = array<i64: 1, 32>}, {pipeline_mode = #tpu.pipeline_mode<synchronous>, transform_indices = @transform_9, window_bounds = array<i64: 1, 32>}, {pipeline_mode = #tpu.pipeline_mode<synchronous>, transform_indices = @transform_10, window_bounds = array<i64: 4, 32, 3>}, {pipeline_mode = #tpu.pipeline_mode<synchronous>, transform_indices = @transform_11, window_bounds = array<i64: 1, 3>}, {transform_indices = @transform_12, window_bounds = array<i64: 1, 1, 3>}]} {
    %c0 = arith.constant 0 : index
    %c0_0 = arith.constant 0 : index
    %0 = vector.load %arg2[%c0, %c0_0] : memref<40x8xbf16, #tpu.memory_space<vmem>>, vector<40x8xbf16>
    %c0_1 = arith.constant 0 : index
    %c0_2 = arith.constant 0 : index
    %1 = vector.load %arg3[%c0_1, %c0_2] : memref<1x8xf32, #tpu.memory_space<vmem>>, vector<1x8xf32>
    %c0_3 = arith.constant 0 : index
    %c0_4 = arith.constant 0 : index
    %2 = vector.load %arg4[%c0_3, %c0_4] : memref<1x8xf32, #tpu.memory_space<vmem>>, vector<1x8xf32>
    %c0_5 = arith.constant 0 : index
    %c0_6 = arith.constant 0 : index
    %3 = tpu.strided_load %arg1[%c0_5, %c0_6] {strides = array<i32: 2, 1>} : memref<64x8xf32, #tpu.memory_space<vmem>>, vector<30x8xf32>
    %c1 = arith.constant 1 : index
    %c0_7 = arith.constant 0 : index
    %4 = tpu.strided_load %arg1[%c1, %c0_7] {strides = array<i32: 2, 1>} : memref<64x8xf32, #tpu.memory_space<vmem>>, vector<30x8xf32>
    %c2 = arith.constant 2 : index
    %c0_8 = arith.constant 0 : index
    %5 = tpu.strided_load %arg1[%c2, %c0_8] {strides = array<i32: 2, 1>} : memref<64x8xf32, #tpu.memory_space<vmem>>, vector<30x8xf32>
    %c3 = arith.constant 3 : index
    %c0_9 = arith.constant 0 : index
    %6 = tpu.strided_load %arg1[%c3, %c0_9] {strides = array<i32: 2, 1>} : memref<64x8xf32, #tpu.memory_space<vmem>>, vector<30x8xf32>
    %c4 = arith.constant 4 : index
    %c0_10 = arith.constant 0 : index
    %7 = tpu.strided_load %arg1[%c4, %c0_10] {strides = array<i32: 2, 1>} : memref<64x8xf32, #tpu.memory_space<vmem>>, vector<30x8xf32>
    %8 = tpu.concatenate %3, %4, %5, %6, %7 in 1 : vector<30x8xf32>, vector<30x8xf32>, vector<30x8xf32>, vector<30x8xf32>, vector<30x8xf32> -> vector<30x40xf32>
    %9 = arith.truncf %8 : vector<30x40xf32> to vector<30x40xbf16>
    %cst = arith.constant dense<0.000000e+00> : vector<30x8xf32>
    %10 = tpu.matmul %9, %0, %cst {dimension_numbers = #tpu.dot_dimension_numbers<[1], [0], [0], [1], [0, 0, 1, 1], [], []>} : vector<30x40xbf16>, vector<40x8xbf16>, vector<30x8xf32> -> vector<30x8xf32>
    %11 = vector.broadcast %1 : vector<1x8xf32> to vector<30x8xf32>
    %12 = arith.mulf %10, %11 : vector<30x8xf32>
    %13 = vector.broadcast %2 : vector<1x8xf32> to vector<30x8xf32>
    %14 = arith.addf %12, %13 : vector<30x8xf32>
    %cst_11 = arith.constant 0.000000e+00 : f32
    %15 = vector.broadcast %cst_11 : f32 to vector<30x8xf32>
    %16 = arith.cmpf ogt, %14, %15 : vector<30x8xf32>
    %cst_12 = arith.constant 0.000000e+00 : f32
    %17 = vector.broadcast %cst_12 : f32 to vector<30x8xf32>
    %18 = arith.minimumf %14, %17 : vector<30x8xf32>
    %19 = math.exp %18 : vector<30x8xf32>
    %cst_13 = arith.constant 1.000000e+00 : f32
    %20 = vector.broadcast %cst_13 : f32 to vector<30x8xf32>
    %21 = arith.subf %19, %20 : vector<30x8xf32>
    %22 = arith.select %16, %14, %21 : vector<30x8xi1>, vector<30x8xf32>
    %c1_14 = arith.constant 1 : index
    %c0_15 = arith.constant 0 : index
    %23 = tpu.strided_load %arg1[%c1_14, %c0_15] {strides = array<i32: 2, 1>} : memref<64x8xf32, #tpu.memory_space<vmem>>, vector<30x8xf32>
    %c2_16 = arith.constant 2 : index
    %c0_17 = arith.constant 0 : index
    %24 = tpu.strided_load %arg1[%c2_16, %c0_17] {strides = array<i32: 2, 1>} : memref<64x8xf32, #tpu.memory_space<vmem>>, vector<30x8xf32>
    %c3_18 = arith.constant 3 : index
    %c0_19 = arith.constant 0 : index
    %25 = tpu.strided_load %arg1[%c3_18, %c0_19] {strides = array<i32: 2, 1>} : memref<64x8xf32, #tpu.memory_space<vmem>>, vector<30x8xf32>
    %c4_20 = arith.constant 4 : index
    %c0_21 = arith.constant 0 : index
    %26 = tpu.strided_load %arg1[%c4_20, %c0_21] {strides = array<i32: 2, 1>} : memref<64x8xf32, #tpu.memory_space<vmem>>, vector<30x8xf32>
    %c5 = arith.constant 5 : index
    %c0_22 = arith.constant 0 : index
    %27 = tpu.strided_load %arg1[%c5, %c0_22] {strides = array<i32: 2, 1>} : memref<64x8xf32, #tpu.memory_space<vmem>>, vector<30x8xf32>
    %28 = tpu.concatenate %23, %24, %25, %26, %27 in 1 : vector<30x8xf32>, vector<30x8xf32>, vector<30x8xf32>, vector<30x8xf32>, vector<30x8xf32> -> vector<30x40xf32>
    %29 = arith.truncf %28 : vector<30x40xf32> to vector<30x40xbf16>
    %cst_23 = arith.constant dense<0.000000e+00> : vector<30x8xf32>
    %30 = tpu.matmul %29, %0, %cst_23 {dimension_numbers = #tpu.dot_dimension_numbers<[1], [0], [0], [1], [0, 0, 1, 1], [], []>} : vector<30x40xbf16>, vector<40x8xbf16>, vector<30x8xf32> -> vector<30x8xf32>
    %31 = vector.broadcast %1 : vector<1x8xf32> to vector<30x8xf32>
    %32 = arith.mulf %30, %31 : vector<30x8xf32>
    %33 = vector.broadcast %2 : vector<1x8xf32> to vector<30x8xf32>
    %34 = arith.addf %32, %33 : vector<30x8xf32>
    %cst_24 = arith.constant 0.000000e+00 : f32
    %35 = vector.broadcast %cst_24 : f32 to vector<30x8xf32>
    %36 = arith.cmpf ogt, %34, %35 : vector<30x8xf32>
    %cst_25 = arith.constant 0.000000e+00 : f32
    %37 = vector.broadcast %cst_25 : f32 to vector<30x8xf32>
    %38 = arith.minimumf %34, %37 : vector<30x8xf32>
    %39 = math.exp %38 : vector<30x8xf32>
    %cst_26 = arith.constant 1.000000e+00 : f32
    %40 = vector.broadcast %cst_26 : f32 to vector<30x8xf32>
    %41 = arith.subf %39, %40 : vector<30x8xf32>
    %42 = arith.select %36, %34, %41 : vector<30x8xi1>, vector<30x8xf32>
    %43 = arith.maximumf %22, %42 : vector<30x8xf32>
    %c0_27 = arith.constant 0 : index
    %c0_28 = arith.constant 0 : index
    %44 = vector.load %arg14[%c0_27, %c0_28] : memref<32x8xf32, #tpu.memory_space<vmem>>, vector<30x8xf32>
    tpu.vector_store %arg14[%c0_27, %c0_28], %43 {strides = array<i32>} : memref<32x8xf32, #tpu.memory_space<vmem>>, vector<30x8xf32>,
    %c0_29 = arith.constant 0 : index
    %c0_30 = arith.constant 0 : index
    %45 = vector.load %arg5[%c0_29, %c0_30] : memref<40x16xbf16, #tpu.memory_space<vmem>>, vector<40x16xbf16>
    %c0_31 = arith.constant 0 : index
    %c0_32 = arith.constant 0 : index
    %46 = vector.load %arg6[%c0_31, %c0_32] : memref<1x16xf32, #tpu.memory_space<vmem>>, vector<1x16xf32>
    %c0_33 = arith.constant 0 : index
    %c0_34 = arith.constant 0 : index
    %47 = vector.load %arg7[%c0_33, %c0_34] : memref<1x16xf32, #tpu.memory_space<vmem>>, vector<1x16xf32>
    %c0_35 = arith.constant 0 : index
    %c0_36 = arith.constant 0 : index
    %48 = tpu.strided_load %arg14[%c0_35, %c0_36] {strides = array<i32: 2, 1>} : memref<32x8xf32, #tpu.memory_space<vmem>>, vector<13x8xf32>
    %c1_37 = arith.constant 1 : index
    %c0_38 = arith.constant 0 : index
    %49 = tpu.strided_load %arg14[%c1_37, %c0_38] {strides = array<i32: 2, 1>} : memref<32x8xf32, #tpu.memory_space<vmem>>, vector<13x8xf32>
    %c2_39 = arith.constant 2 : index
    %c0_40 = arith.constant 0 : index
    %50 = tpu.strided_load %arg14[%c2_39, %c0_40] {strides = array<i32: 2, 1>} : memref<32x8xf32, #tpu.memory_space<vmem>>, vector<13x8xf32>
    %c3_41 = arith.constant 3 : index
    %c0_42 = arith.constant 0 : index
    %51 = tpu.strided_load %arg14[%c3_41, %c0_42] {strides = array<i32: 2, 1>} : memref<32x8xf32, #tpu.memory_space<vmem>>, vector<13x8xf32>
    %c4_43 = arith.constant 4 : index
    %c0_44 = arith.constant 0 : index
    %52 = tpu.strided_load %arg14[%c4_43, %c0_44] {strides = array<i32: 2, 1>} : memref<32x8xf32, #tpu.memory_space<vmem>>, vector<13x8xf32>
    %53 = tpu.concatenate %48, %49, %50, %51, %52 in 1 : vector<13x8xf32>, vector<13x8xf32>, vector<13x8xf32>, vector<13x8xf32>, vector<13x8xf32> -> vector<13x40xf32>
    %54 = arith.truncf %53 : vector<13x40xf32> to vector<13x40xbf16>
    %cst_45 = arith.constant dense<0.000000e+00> : vector<13x16xf32>
    %55 = tpu.matmul %54, %45, %cst_45 {dimension_numbers = #tpu.dot_dimension_numbers<[1], [0], [0], [1], [0, 0, 1, 1], [], []>} : vector<13x40xbf16>, vector<40x16xbf16>, vector<13x16xf32> -> vector<13x16xf32>
    %56 = vector.broadcast %46 : vector<1x16xf32> to vector<13x16xf32>
    %57 = arith.mulf %55, %56 : vector<13x16xf32>
    %58 = vector.broadcast %47 : vector<1x16xf32> to vector<13x16xf32>
    %59 = arith.addf %57, %58 : vector<13x16xf32>
    %cst_46 = arith.constant 0.000000e+00 : f32
    %60 = vector.broadcast %cst_46 : f32 to vector<13x16xf32>
    %61 = arith.cmpf ogt, %59, %60 : vector<13x16xf32>
    %cst_47 = arith.constant 0.000000e+00 : f32
    %62 = vector.broadcast %cst_47 : f32 to vector<13x16xf32>
    %63 = arith.minimumf %59, %62 : vector<13x16xf32>
    %64 = math.exp %63 : vector<13x16xf32>
    %cst_48 = arith.constant 1.000000e+00 : f32
    %65 = vector.broadcast %cst_48 : f32 to vector<13x16xf32>
    %66 = arith.subf %64, %65 : vector<13x16xf32>
    %67 = arith.select %61, %59, %66 : vector<13x16xi1>, vector<13x16xf32>
    %c1_49 = arith.constant 1 : index
    %c0_50 = arith.constant 0 : index
    %68 = tpu.strided_load %arg14[%c1_49, %c0_50] {strides = array<i32: 2, 1>} : memref<32x8xf32, #tpu.memory_space<vmem>>, vector<13x8xf32>
    %c2_51 = arith.constant 2 : index
    %c0_52 = arith.constant 0 : index
    %69 = tpu.strided_load %arg14[%c2_51, %c0_52] {strides = array<i32: 2, 1>} : memref<32x8xf32, #tpu.memory_space<vmem>>, vector<13x8xf32>
    %c3_53 = arith.constant 3 : index
    %c0_54 = arith.constant 0 : index
    %70 = tpu.strided_load %arg14[%c3_53, %c0_54] {strides = array<i32: 2, 1>} : memref<32x8xf32, #tpu.memory_space<vmem>>, vector<13x8xf32>
    %c4_55 = arith.constant 4 : index
    %c0_56 = arith.constant 0 : index
    %71 = tpu.strided_load %arg14[%c4_55, %c0_56] {strides = array<i32: 2, 1>} : memref<32x8xf32, #tpu.memory_space<vmem>>, vector<13x8xf32>
    %c5_57 = arith.constant 5 : index
    %c0_58 = arith.constant 0 : index
    %72 = tpu.strided_load %arg14[%c5_57, %c0_58] {strides = array<i32: 2, 1>} : memref<32x8xf32, #tpu.memory_space<vmem>>, vector<13x8xf32>
    %73 = tpu.concatenate %68, %69, %70, %71, %72 in 1 : vector<13x8xf32>, vector<13x8xf32>, vector<13x8xf32>, vector<13x8xf32>, vector<13x8xf32> -> vector<13x40xf32>
    %74 = arith.truncf %73 : vector<13x40xf32> to vector<13x40xbf16>
    %cst_59 = arith.constant dense<0.000000e+00> : vector<13x16xf32>
    %75 = tpu.matmul %74, %45, %cst_59 {dimension_numbers = #tpu.dot_dimension_numbers<[1], [0], [0], [1], [0, 0, 1, 1], [], []>} : vector<13x40xbf16>, vector<40x16xbf16>, vector<13x16xf32> -> vector<13x16xf32>
    %76 = vector.broadcast %46 : vector<1x16xf32> to vector<13x16xf32>
    %77 = arith.mulf %75, %76 : vector<13x16xf32>
    %78 = vector.broadcast %47 : vector<1x16xf32> to vector<13x16xf32>
    %79 = arith.addf %77, %78 : vector<13x16xf32>
    %cst_60 = arith.constant 0.000000e+00 : f32
    %80 = vector.broadcast %cst_60 : f32 to vector<13x16xf32>
    %81 = arith.cmpf ogt, %79, %80 : vector<13x16xf32>
    %cst_61 = arith.constant 0.000000e+00 : f32
    %82 = vector.broadcast %cst_61 : f32 to vector<13x16xf32>
    %83 = arith.minimumf %79, %82 : vector<13x16xf32>
    %84 = math.exp %83 : vector<13x16xf32>
    %cst_62 = arith.constant 1.000000e+00 : f32
    %85 = vector.broadcast %cst_62 : f32 to vector<13x16xf32>
    %86 = arith.subf %84, %85 : vector<13x16xf32>
    %87 = arith.select %81, %79, %86 : vector<13x16xi1>, vector<13x16xf32>
    %88 = arith.maximumf %67, %87 : vector<13x16xf32>
    %c0_63 = arith.constant 0 : index
    %c0_64 = arith.constant 0 : index
    %89 = vector.load %arg15[%c0_63, %c0_64] : memref<16x16xf32, #tpu.memory_space<vmem>>, vector<13x16xf32>
    tpu.vector_store %arg15[%c0_63, %c0_64], %88 {strides = array<i32>} : memref<16x16xf32, #tpu.memory_space<vmem>>, vector<13x16xf32>,
    %c0_65 = arith.constant 0 : index
    %c0_66 = arith.constant 0 : index
    %90 = vector.load %arg8[%c0_65, %c0_66] : memref<80x32xbf16, #tpu.memory_space<vmem>>, vector<80x32xbf16>
    %c0_67 = arith.constant 0 : index
    %c0_68 = arith.constant 0 : index
    %91 = vector.load %arg9[%c0_67, %c0_68] : memref<1x32xf32, #tpu.memory_space<vmem>>, vector<1x32xf32>
    %c0_69 = arith.constant 0 : index
    %c0_70 = arith.constant 0 : index
    %92 = vector.load %arg10[%c0_69, %c0_70] : memref<1x32xf32, #tpu.memory_space<vmem>>, vector<1x32xf32>
    %c0_71 = arith.constant 0 : index
    %c0_72 = arith.constant 0 : index
    %93 = tpu.strided_load %arg15[%c0_71, %c0_72] {strides = array<i32: 2, 1>} : memref<16x16xf32, #tpu.memory_space<vmem>>, vector<4x16xf32>
    %c1_73 = arith.constant 1 : index
    %c0_74 = arith.constant 0 : index
    %94 = tpu.strided_load %arg15[%c1_73, %c0_74] {strides = array<i32: 2, 1>} : memref<16x16xf32, #tpu.memory_space<vmem>>, vector<4x16xf32>
    %c2_75 = arith.constant 2 : index
    %c0_76 = arith.constant 0 : index
    %95 = tpu.strided_load %arg15[%c2_75, %c0_76] {strides = array<i32: 2, 1>} : memref<16x16xf32, #tpu.memory_space<vmem>>, vector<4x16xf32>
    %c3_77 = arith.constant 3 : index
    %c0_78 = arith.constant 0 : index
    %96 = tpu.strided_load %arg15[%c3_77, %c0_78] {strides = array<i32: 2, 1>} : memref<16x16xf32, #tpu.memory_space<vmem>>, vector<4x16xf32>
    %c4_79 = arith.constant 4 : index
    %c0_80 = arith.constant 0 : index
    %97 = tpu.strided_load %arg15[%c4_79, %c0_80] {strides = array<i32: 2, 1>} : memref<16x16xf32, #tpu.memory_space<vmem>>, vector<4x16xf32>
    %98 = tpu.concatenate %93, %94, %95, %96, %97 in 1 : vector<4x16xf32>, vector<4x16xf32>, vector<4x16xf32>, vector<4x16xf32>, vector<4x16xf32> -> vector<4x80xf32>
    %99 = arith.truncf %98 : vector<4x80xf32> to vector<4x80xbf16>
    %cst_81 = arith.constant dense<0.000000e+00> : vector<4x32xf32>
    %100 = tpu.matmul %99, %90, %cst_81 {dimension_numbers = #tpu.dot_dimension_numbers<[1], [0], [0], [1], [0, 0, 1, 1], [], []>} : vector<4x80xbf16>, vector<80x32xbf16>, vector<4x32xf32> -> vector<4x32xf32>
    %101 = vector.broadcast %91 : vector<1x32xf32> to vector<4x32xf32>
    %102 = arith.mulf %100, %101 : vector<4x32xf32>
    %103 = vector.broadcast %92 : vector<1x32xf32> to vector<4x32xf32>
    %104 = arith.addf %102, %103 : vector<4x32xf32>
    %cst_82 = arith.constant 0.000000e+00 : f32
    %105 = vector.broadcast %cst_82 : f32 to vector<4x32xf32>
    %106 = arith.cmpf ogt, %104, %105 : vector<4x32xf32>
    %cst_83 = arith.constant 0.000000e+00 : f32
    %107 = vector.broadcast %cst_83 : f32 to vector<4x32xf32>
    %108 = arith.minimumf %104, %107 : vector<4x32xf32>
    %109 = math.exp %108 : vector<4x32xf32>
    %cst_84 = arith.constant 1.000000e+00 : f32
    %110 = vector.broadcast %cst_84 : f32 to vector<4x32xf32>
    %111 = arith.subf %109, %110 : vector<4x32xf32>
    %112 = arith.select %106, %104, %111 : vector<4x32xi1>, vector<4x32xf32>
    %c1_85 = arith.constant 1 : index
    %c0_86 = arith.constant 0 : index
    %113 = tpu.strided_load %arg15[%c1_85, %c0_86] {strides = array<i32: 2, 1>} : memref<16x16xf32, #tpu.memory_space<vmem>>, vector<4x16xf32>
    %c2_87 = arith.constant 2 : index
    %c0_88 = arith.constant 0 : index
    %114 = tpu.strided_load %arg15[%c2_87, %c0_88] {strides = array<i32: 2, 1>} : memref<16x16xf32, #tpu.memory_space<vmem>>, vector<4x16xf32>
    %c3_89 = arith.constant 3 : index
    %c0_90 = arith.constant 0 : index
    %115 = tpu.strided_load %arg15[%c3_89, %c0_90] {strides = array<i32: 2, 1>} : memref<16x16xf32, #tpu.memory_space<vmem>>, vector<4x16xf32>
    %c4_91 = arith.constant 4 : index
    %c0_92 = arith.constant 0 : index
    %116 = tpu.strided_load %arg15[%c4_91, %c0_92] {strides = array<i32: 2, 1>} : memref<16x16xf32, #tpu.memory_space<vmem>>, vector<4x16xf32>
    %c5_93 = arith.constant 5 : index
    %c0_94 = arith.constant 0 : index
    %117 = tpu.strided_load %arg15[%c5_93, %c0_94] {strides = array<i32: 2, 1>} : memref<16x16xf32, #tpu.memory_space<vmem>>, vector<4x16xf32>
    %118 = tpu.concatenate %113, %114, %115, %116, %117 in 1 : vector<4x16xf32>, vector<4x16xf32>, vector<4x16xf32>, vector<4x16xf32>, vector<4x16xf32> -> vector<4x80xf32>
    %119 = arith.truncf %118 : vector<4x80xf32> to vector<4x80xbf16>
    %cst_95 = arith.constant dense<0.000000e+00> : vector<4x32xf32>
    %120 = tpu.matmul %119, %90, %cst_95 {dimension_numbers = #tpu.dot_dimension_numbers<[1], [0], [0], [1], [0, 0, 1, 1], [], []>} : vector<4x80xbf16>, vector<80x32xbf16>, vector<4x32xf32> -> vector<4x32xf32>
    %121 = vector.broadcast %91 : vector<1x32xf32> to vector<4x32xf32>
    %122 = arith.mulf %120, %121 : vector<4x32xf32>
    %123 = vector.broadcast %92 : vector<1x32xf32> to vector<4x32xf32>
    %124 = arith.addf %122, %123 : vector<4x32xf32>
    %cst_96 = arith.constant 0.000000e+00 : f32
    %125 = vector.broadcast %cst_96 : f32 to vector<4x32xf32>
    %126 = arith.cmpf ogt, %124, %125 : vector<4x32xf32>
    %cst_97 = arith.constant 0.000000e+00 : f32
    %127 = vector.broadcast %cst_97 : f32 to vector<4x32xf32>
    %128 = arith.minimumf %124, %127 : vector<4x32xf32>
    %129 = math.exp %128 : vector<4x32xf32>
    %cst_98 = arith.constant 1.000000e+00 : f32
    %130 = vector.broadcast %cst_98 : f32 to vector<4x32xf32>
    %131 = arith.subf %129, %130 : vector<4x32xf32>
    %132 = arith.select %126, %124, %131 : vector<4x32xi1>, vector<4x32xf32>
    %133 = arith.maximumf %112, %132 : vector<4x32xf32>
    %c0_99 = arith.constant 0 : index
    %c0_100 = arith.constant 0 : index
    %134 = vector.load %arg16[%c0_99, %c0_100] : memref<8x32xf32, #tpu.memory_space<vmem>>, vector<4x32xf32>
    tpu.vector_store %arg16[%c0_99, %c0_100], %133 {strides = array<i32>} : memref<8x32xf32, #tpu.memory_space<vmem>>, vector<4x32xf32>,
    %cst_101 = arith.constant 0.000000e+00 : f32
    %135 = vector.broadcast %cst_101 : f32 to vector<1x3xf32>
    %c0_102 = arith.constant 0 : index
    %c0_103 = arith.constant 0 : index
    %136 = tpu.strided_load %arg16[%c0_102, %c0_103] {strides = array<i32: 8, 1>} : memref<8x32xf32, #tpu.memory_space<vmem>>, vector<1x32xf32>
    %137 = arith.truncf %136 : vector<1x32xf32> to vector<1x32xbf16>
    %c0_104 = arith.constant 0 : index
    %c0_105 = arith.constant 0 : index
    %c0_106 = arith.constant 0 : index
    %138 = vector.load %arg11[%c0_104, %c0_105, %c0_106] : memref<4x32x3xbf16, #tpu.memory_space<vmem>>, vector<1x32x3xbf16>
    %139 = vector.shape_cast %138 : vector<1x32x3xbf16> to vector<32x3xbf16>
    %cst_107 = arith.constant dense<0.000000e+00> : vector<1x3xf32>
    %140 = tpu.matmul %137, %139, %cst_107 {dimension_numbers = #tpu.dot_dimension_numbers<[1], [0], [0], [1], [0, 0, 1, 1], [], []>} : vector<1x32xbf16>, vector<32x3xbf16>, vector<1x3xf32> -> vector<1x3xf32>
    %141 = arith.addf %135, %140 : vector<1x3xf32>
    %c1_108 = arith.constant 1 : index
    %c0_109 = arith.constant 0 : index
    %142 = tpu.strided_load %arg16[%c1_108, %c0_109] {strides = array<i32: 8, 1>} : memref<8x32xf32, #tpu.memory_space<vmem>>, vector<1x32xf32>
    %143 = arith.truncf %142 : vector<1x32xf32> to vector<1x32xbf16>
    %c1_110 = arith.constant 1 : index
    %c0_111 = arith.constant 0 : index
    %c0_112 = arith.constant 0 : index
    %144 = vector.load %arg11[%c1_110, %c0_111, %c0_112] : memref<4x32x3xbf16, #tpu.memory_space<vmem>>, vector<1x32x3xbf16>
    %145 = vector.shape_cast %144 : vector<1x32x3xbf16> to vector<32x3xbf16>
    %cst_113 = arith.constant dense<0.000000e+00> : vector<1x3xf32>
    %146 = tpu.matmul %143, %145, %cst_113 {dimension_numbers = #tpu.dot_dimension_numbers<[1], [0], [0], [1], [0, 0, 1, 1], [], []>} : vector<1x32xbf16>, vector<32x3xbf16>, vector<1x3xf32> -> vector<1x3xf32>
    %147 = arith.addf %141, %146 : vector<1x3xf32>
    %c2_114 = arith.constant 2 : index
    %c0_115 = arith.constant 0 : index
    %148 = tpu.strided_load %arg16[%c2_114, %c0_115] {strides = array<i32: 8, 1>} : memref<8x32xf32, #tpu.memory_space<vmem>>, vector<1x32xf32>
    %149 = arith.truncf %148 : vector<1x32xf32> to vector<1x32xbf16>
    %c2_116 = arith.constant 2 : index
    %c0_117 = arith.constant 0 : index
    %c0_118 = arith.constant 0 : index
    %150 = vector.load %arg11[%c2_116, %c0_117, %c0_118] : memref<4x32x3xbf16, #tpu.memory_space<vmem>>, vector<1x32x3xbf16>
    %151 = vector.shape_cast %150 : vector<1x32x3xbf16> to vector<32x3xbf16>
    %cst_119 = arith.constant dense<0.000000e+00> : vector<1x3xf32>
    %152 = tpu.matmul %149, %151, %cst_119 {dimension_numbers = #tpu.dot_dimension_numbers<[1], [0], [0], [1], [0, 0, 1, 1], [], []>} : vector<1x32xbf16>, vector<32x3xbf16>, vector<1x3xf32> -> vector<1x3xf32>
    %153 = arith.addf %147, %152 : vector<1x3xf32>
    %c3_120 = arith.constant 3 : index
    %c0_121 = arith.constant 0 : index
    %154 = tpu.strided_load %arg16[%c3_120, %c0_121] {strides = array<i32: 8, 1>} : memref<8x32xf32, #tpu.memory_space<vmem>>, vector<1x32xf32>
    %155 = arith.truncf %154 : vector<1x32xf32> to vector<1x32xbf16>
    %c3_122 = arith.constant 3 : index
    %c0_123 = arith.constant 0 : index
    %c0_124 = arith.constant 0 : index
    %156 = vector.load %arg11[%c3_122, %c0_123, %c0_124] : memref<4x32x3xbf16, #tpu.memory_space<vmem>>, vector<1x32x3xbf16>
    %157 = vector.shape_cast %156 : vector<1x32x3xbf16> to vector<32x3xbf16>
    %cst_125 = arith.constant dense<0.000000e+00> : vector<1x3xf32>
    %158 = tpu.matmul %155, %157, %cst_125 {dimension_numbers = #tpu.dot_dimension_numbers<[1], [0], [0], [1], [0, 0, 1, 1], [], []>} : vector<1x32xbf16>, vector<32x3xbf16>, vector<1x3xf32> -> vector<1x3xf32>
    %159 = arith.addf %153, %158 : vector<1x3xf32>
    %c0_126 = arith.constant 0 : index
    %c0_127 = arith.constant 0 : index
    %160 = vector.load %arg12[%c0_126, %c0_127] : memref<1x3xf32, #tpu.memory_space<vmem>>, vector<1x3xf32>
    %161 = arith.addf %159, %160 : vector<1x3xf32>
    %c0_128 = arith.constant 0 : index
    %c0_129 = arith.constant 0 : index
    %c0_130 = arith.constant 0 : index
    %162 = vector.load %arg13[%c0_128, %c0_129, %c0_130] : memref<1x1x3xf32, #tpu.memory_space<vmem>>, vector<1x1x3xf32>
    %163 = vector.shape_cast %162 : vector<1x1x3xf32> to vector<1x3xf32>
    %164 = vector.shape_cast %161 : vector<1x3xf32> to vector<1x1x3xf32>
    tpu.vector_store %arg13[%c0_128, %c0_129, %c0_130], %164 {strides = array<i32>} : memref<1x1x3xf32, #tpu.memory_space<vmem>>, vector<1x1x3xf32>,
    return
  }
  func.func @transform_0(%arg0: i32) -> (i32, i32) {
    %c0_i32 = arith.constant 0 : i32
    %c0_i32_0 = arith.constant 0 : i32
    return %arg0, %c0_i32 : i32, i32
  }
  func.func @transform_1(%arg0: i32) -> (i32, i32) {
    %c0_i32 = arith.constant 0 : i32
    %c0_i32_0 = arith.constant 0 : i32
    %c0_i32_1 = arith.constant 0 : i32
    return %c0_i32, %c0_i32_0 : i32, i32
  }
  func.func @transform_2(%arg0: i32) -> (i32, i32) {
    %c0_i32 = arith.constant 0 : i32
    %c0_i32_0 = arith.constant 0 : i32
    %c0_i32_1 = arith.constant 0 : i32
    return %c0_i32, %c0_i32_0 : i32, i32
  }
  func.func @transform_3(%arg0: i32) -> (i32, i32) {
    %c0_i32 = arith.constant 0 : i32
    %c0_i32_0 = arith.constant 0 : i32
    %c0_i32_1 = arith.constant 0 : i32
    return %c0_i32, %c0_i32_0 : i32, i32
  }
  func.func @transform_4(%arg0: i32) -> (i32, i32) {
    %c0_i32 = arith.constant 0 : i32
    %c0_i32_0 = arith.constant 0 : i32
    %c0_i32_1 = arith.constant 0 : i32
    return %c0_i32, %c0_i32_0 : i32, i32
  }
  func.func @transform_5(%arg0: i32) -> (i32, i32) {
    %c0_i32 = arith.constant 0 : i32
    %c0_i32_0 = arith.constant 0 : i32
    %c0_i32_1 = arith.constant 0 : i32
    return %c0_i32, %c0_i32_0 : i32, i32
  }
  func.func @transform_6(%arg0: i32) -> (i32, i32) {
    %c0_i32 = arith.constant 0 : i32
    %c0_i32_0 = arith.constant 0 : i32
    %c0_i32_1 = arith.constant 0 : i32
    return %c0_i32, %c0_i32_0 : i32, i32
  }
  func.func @transform_7(%arg0: i32) -> (i32, i32) {
    %c0_i32 = arith.constant 0 : i32
    %c0_i32_0 = arith.constant 0 : i32
    %c0_i32_1 = arith.constant 0 : i32
    return %c0_i32, %c0_i32_0 : i32, i32
  }
  func.func @transform_8(%arg0: i32) -> (i32, i32) {
    %c0_i32 = arith.constant 0 : i32
    %c0_i32_0 = arith.constant 0 : i32
    %c0_i32_1 = arith.constant 0 : i32
    return %c0_i32, %c0_i32_0 : i32, i32
  }
  func.func @transform_9(%arg0: i32) -> (i32, i32) {
    %c0_i32 = arith.constant 0 : i32
    %c0_i32_0 = arith.constant 0 : i32
    %c0_i32_1 = arith.constant 0 : i32
    return %c0_i32, %c0_i32_0 : i32, i32
  }
  func.func @transform_10(%arg0: i32) -> (i32, i32, i32) {
    %c0_i32 = arith.constant 0 : i32
    %c0_i32_0 = arith.constant 0 : i32
    %c0_i32_1 = arith.constant 0 : i32
    %c0_i32_2 = arith.constant 0 : i32
    return %c0_i32, %c0_i32_0, %c0_i32_1 : i32, i32, i32
  }
  func.func @transform_11(%arg0: i32) -> (i32, i32) {
    %c0_i32 = arith.constant 0 : i32
    %c0_i32_0 = arith.constant 0 : i32
    %c0_i32_1 = arith.constant 0 : i32
    return %c0_i32, %c0_i32_0 : i32, i32
  }
  func.func @transform_12(%arg0: i32) -> (i32, i32, i32) {
    %c0_i32 = arith.constant 0 : i32
    %c0_i32_0 = arith.constant 0 : i32
    %c0_i32_1 = arith.constant 0 : i32
    return %arg0, %c0_i32, %c0_i32_0 : i32, i32, i32
  }
}

</mosaic_0001>

<bundles_post_ra>
// kernel: deep_conv_net_forward.1
= control target key start
LH: loop header
LB: loop body
LE: loop exit
PB: predicated region body
PF: predicated region fallthrough
CT: control target
= control target key end

     0   :  { %s2137_s21 = smov 0   ;;  %s2423_s0 = inlined_call_operand.vmem [shape: f32[128,8], index: 0, kind: input, shape index: {}]   ;;  %s2424_s1 = inlined_call_operand.vmem [shape: bf16[40,8], index: 1, kind: input, shape index: {}]   ;;  %s2425_s2 = inlined_call_operand.vmem [shape: f32[1,8], index: 2, kind: input, shape index: {}]   ;;  %s2426_s3 = inlined_call_operand.vmem [shape: f32[1,8], index: 3, kind: input, shape index: {}]   ;;  %s2427_s4 = inlined_call_operand.vmem [shape: bf16[40,16], index: 4, kind: input, shape index: {}]   ;;  %s2428_s5 = inlined_call_operand.vmem [shape: f32[1,16], index: 5, kind: input, shape index: {}]   ;;  %s2429_s6 = inlined_call_operand.vmem [shape: f32[1,16], index: 6, kind: input, shape index: {}]   ;;  %s2430_s7 = inlined_call_operand.vmem [shape: bf16[80,32], index: 7, kind: input, shape index: {}]   ;;  %s2431_s8 = inlined_call_operand.vmem [shape: f32[1,32], index: 8, kind: input, shape index: {}]   ;;  %s2432_s9 = inlined_call_operand.vmem [shape: f32[1,32], index: 9, kind: input, shape index: {}]   ;;  %s2433_s10 = inlined_call_operand.vmem [shape: bf16[4,32,3], index: 10, kind: input, shape index: {}]   ;;  %s2434_s11 = inlined_call_operand.vmem [shape: f32[1,3], index: 11, kind: input, shape index: {}]   ;;  %s2435_s12 = inlined_call_operand.vmem [shape: f32[2,1,3], index: 12, kind: output, shape index: {}]  }
   0x1 LB: > { %s2143_s22 = sadd.s32 4294967295, %s2062_s21   ;;  %p1618_p0 = scmp.ge.s32.totalorder %s2062_s21, 1  ;;  %s2062_s21 = sphi %s2137_s21, %s22_s21  }
   0x2   : > { %p363_p1 = scmp.lt.s32.totalorder %s2062_s21, 3 }
   0x4   : > { %p364_p2 = pnand %p1618_p0, %p363_p1 }
   0x5   : > { %s1619_s23 = sshll.u32 (!%p364_p2), %s2143_s22, 3  ;;  %s2064_s28 = smov (!%p364_p2), 8   ;;  %v2009_v17 = vld [vmem:[%s2424_s1] sm:$0xff] (!%p364_p2)   ;;  %v2010_v20 = vld [vmem:[%s2424_s1 + $0x8] sm:$0xff] (!%p364_p2)   ;;  %v2011_v23 = vld [vmem:[%s2424_s1 + $0x10] ss:$0 sps:$4 sm:$0xff] (!%p364_p2)  }
   0x6   : > { %367 = sbr.rel (%p364_p2) target bundleno = 1400 (0x578), region = 68  ;;  %p404_p3 = scmp.lt.s32.totalorder (!%p364_p2), %s1619_s23, 15  ;;  %1751 = vmatprep.subr.bf16.mxu0 (!%p364_p2), %v2009_v17  ;;  %1761 = vmatprep.subr.bf16.mxu1 (!%p364_p2), %v2009_v17  ;;  %vm567_vm0 = vcmask (!%p364_p2), 1043456   ;;  %vm523_vm1 = vcmask (!%p364_p2), 64512   ;;  %vm528_vm2 = vcmask (!%p364_p2), 130048   ;;  %vm533_vm3 = vcmask (!%p364_p2), 195584  }
   0x7   : > { %s2065_s29 = smov (!%p364_p2), 16   ;;  %1752 = vmatpush3.bf16.msra.mxu0 (!%p364_p2), %v2009_v17  ;;  %1762 = vmatpush3.bf16.msra.mxu1 (!%p364_p2), %v2009_v17  ;;  %s2066_s16 = smov (!%p364_p2), 24   ;;  %v569_v26 = vsel (!%p364_p2), %vm567_vm0, %v2011_v23, 0  ;;  %vm538_vm4 = vcmask (!%p364_p2), 261120   ;;  %vm560_vm5 = vcmask (!%p364_p2), 326656   ;;  %vm836_vm12 = vcmask (!%p364_p2), 62464  }
   0x8   : > { %1753 = vmatprep.subr.bf16.mxu0 (!%p364_p2), %v2010_v20  ;;  %1763 = vmatprep.subr.bf16.mxu1 (!%p364_p2), %v2010_v20  ;;  %s2067_s19 = smov (!%p364_p2), 32   ;;  %vm2069_vm15 = vmmov (!%p364_p2), 0   ;;  %p409_p4 = scmp.lt.s32.totalorder (!%p364_p2), %s2143_s22, 1 }
   0xb   : > { %1754 = vmatpush3.bf16.msra.mxu0 (!%p364_p2), %v2010_v20  ;;  %1764 = vmatpush3.bf16.msra.mxu1 (!%p364_p2), %v2010_v20 }
   0xc   : > { %1851 = vmatprep.subr.msk.bf16.mxu0 (!%p364_p2), %vm567_vm0, %v2011_v23  ;;  %1852 = vmatprep.subr.msk.bf16.mxu1 (!%p364_p2), %vm567_vm0, %v2011_v23 }
   0xd   : > { %s2437_s23 = smov (!%p404_p3, %s1619_s23), 15  ;;  %s2439_s22 = smov (!%p409_p4, %s2143_s22), 1 }
   0xe   : > { %s1620_s24 = sshll.u32 %s2437_s23, 3  ;;  %s411_s26 = scalar_lea.vmem %s2435_s12, %s2439_s22 }
   0xf   : > { %s2151_s27 = scalar_lea.vmem %s2423_s0, %s1620_s24  ;;  %1756 = vmatpush3.bf16.msra.mxu0 %v569_v26  ;;  %1766 = vmatpush3.bf16.msra.mxu1 %v569_v26 }
  0x10   : > { %v2154_v0 = vld [vmem:[%s2151_s27 + $0x21] ss:$2 sm:$0xff]  ;;  %v2157_v1 = vld [vmem:[%s2151_s27 + $0x31] ss:$2 sm:$0x3f] }
  0x11   : > { %v1879_v2 = vpack.i.bf16 %v2157_v1, %v2154_v0  ;;  %v2162_v3 = vld [vmem:[%s2151_s27 + $0x1] ss:$2 sm:$0xff]  ;;  %v2165_v4 = vld [vmem:[%s2151_s27 + $0x11] ss:$2 sm:$0xff]  ;;  %v1628_v5 = vld [vmem:[%s2151_s27 + $0x2] ss:$2 sm:$0xff] }
  0x12   : > { %v1869_v6 = vpack.i.bf16 %v2165_v4, %v2162_v3  ;;  %v1629_v7 = vld [vmem:[%s2151_s27 + $0x12] ss:$2 sm:$0xff]  ;;  %v1632_v9 = vld [vmem:[%s2151_s27 + $0x3] ss:$2 sm:$0xff]  ;;  %v1633_v10 = vld [vmem:[%s2151_s27 + $0x13] ss:$2 sm:$0xff] }
  0x13   : > { %1880 = vrot.lane.b32.xlu1 %v1879_v2, %s2064_s28  ;;  %v1884_v8 = vpack.i.bf16 %v1629_v7, %v1628_v5  ;;  %v1630_v11 = vld [vmem:[%s2151_s27 + $0x22] ss:$2 sm:$0xff]  ;;  %v1631_v12 = vld [vmem:[%s2151_s27 + $0x32] ss:$2 sm:$0x3f]  ;;  %v1894_v13 = vpack.i.bf16 %v1633_v10, %v1632_v9 }
  0x14   : > { %1870 = vrot.lane.b32.xlu0 %v1869_v6, %s2064_s28  ;;  %v1889_v14 = vpack.i.bf16 %v1631_v12, %v1630_v11  ;;  %v1636_v15 = vld [vmem:[%s2151_s27 + $0x4] ss:$2 sm:$0xff]  ;;  %v1637_v16 = vld [vmem:[%s2151_s27 + $0x14] ss:$2 sm:$0xff]  ;;  %v1634_v19 = vld [vmem:[%s2151_s27 + $0x23] ss:$2 sm:$0xff] }
  0x15   : > { %v1635_v18 = vld [vmem:[%s2151_s27 + $0x33] ss:$2 sm:$0x3f]  ;;  %v1914_v21 = vpack.i.bf16 %v1637_v16, %v1636_v15  ;;  %v1638_v27 = vld [vmem:[%s2151_s27 + $0x24] ss:$2 sm:$0xff] }
  0x16   : > { %v1909_v22 = vpack.i.bf16 %v1635_v18, %v1634_v19  ;;  %v1651_v24 = vld [vmem:[%s2151_s27 + $0x5] ss:$2 sm:$0xff]  ;;  %v1652_v25 = vld [vmem:[%s2151_s27 + $0x15] ss:$2 sm:$0xff]  ;;  %v1622_v44 = vld [vmem:[%s2151_s27 + $0x20] ss:$2 sm:$0xff] }
  0x17   : > { %1885 = vrot.lane.b32.xlu1 %v1884_v8, %s2065_s29  ;;  %v1639_v28 = vld [vmem:[%s2151_s27 + $0x34] ss:$2 sm:$0x3f]  ;;  %v1934_v29 = vpack.i.bf16 %v1652_v25, %v1651_v24  ;;  %v1653_v31 = vld [vmem:[%s2151_s27 + $0x25] ss:$2 sm:$0xff] }
  0x18   : > { %1875 = vrot.lane.b32.xlu0 %v1884_v8, %s2064_s28  ;;  %v1929_v30 = vpack.i.bf16 %v1639_v28, %v1638_v27  ;;  %v1654_v32 = vld [vmem:[%s2151_s27 + $0x35] ss:$2 sm:$0x3f]  ;;  %v1623_v45 = vld [vmem:[%s2151_s27 + $0x30] ss:$2 sm:$0x3f] }
  0x19   : > { %v1944_v33 = vpack.i.bf16 %v1654_v32, %v1653_v31  ;;  %v420_v48 = vld [vmem:[%s2151_s27] ss:$2 sm:$0xff]  ;;  %v1621_v49 = vld [vmem:[%s2151_s27 + $0x10] ss:$2 sm:$0xff] }
  0x1b   : > { %1895 = vrot.lane.b32.xlu1 %v1894_v13, %s2065_s29 }
  0x1c   : > { %1890 = vrot.lane.b32.xlu0 %v1889_v14, %s2064_s28 }
  0x1f   : > { %1905 = vrot.lane.b32.xlu1 %v1894_v13, %s2066_s16 }
  0x20   : > { %1900 = vrot.lane.b32.xlu0 %v1889_v14, %s2065_s29 }
  0x23   : > { %1915 = vrot.lane.b32.xlu1 %v1914_v21, %s2066_s16 }
  0x24   : > { %1910 = vrot.lane.b32.xlu0 %v1909_v22, %s2065_s29 }
  0x27   : > { %1925 = vrot.lane.b32.xlu1 %v1914_v21, %s2067_s19 }
  0x28   : > { %1920 = vrot.lane.b32.xlu0 %v1909_v22, %s2066_s16 }
  0x2b   : > { %1935 = vrot.lane.b32.xlu1 %v1934_v29, %s2067_s19 }
  0x2c   : > { %1930 = vrot.lane.b32.xlu0 %v1929_v30, %s2066_s16 }
  0x2f   : > { %1945 = vrot.lane.b32.xlu1 %v1944_v33, %s2067_s19 }
  0x30   : > { %1940 = vrot.lane.b32.xlu0 %v1929_v30, %s2067_s19 }
  0x85   : > { %v1881_v34 = vpop.permute.xlu1 %1880 }
  0x86   : > { %v1871_v35 = vpop.permute.xlu0 %1870  ;;  %v1883_v42 = vunpack.i.h.bf16 %v1881_v34  ;;  %v1882_v43 = vunpack.i.l.bf16 %v1881_v34 }
  0x87   : > { %v1873_v46 = vunpack.i.h.bf16 %v1871_v35  ;;  %v1872_v47 = vunpack.i.l.bf16 %v1871_v35 }
  0x88   : > { %v526_v56 = vsel %vm523_vm1, %v1622_v44, %v1882_v43  ;;  %v527_v57 = vsel %vm523_vm1, %v1623_v45, %v1883_v42 }
  0x89   : > { %v1886_v36 = vpop.permute.xlu1 %1885  ;;  %v524_v60 = vsel %vm523_vm1, %v420_v48, %v1872_v47  ;;  %v525_v61 = vsel %vm523_vm1, %v1621_v49, %v1873_v46 }
  0x8a   : > { %v1876_v37 = vpop.permute.xlu0 %1875  ;;  %v1888_v50 = vunpack.i.h.bf16 %v1886_v36  ;;  %v1887_v51 = vunpack.i.l.bf16 %v1886_v36 }
  0x8b   : > { %v1878_v52 = vunpack.i.h.bf16 %v1876_v37  ;;  %v1877_v54 = vunpack.i.l.bf16 %v1876_v37 }
  0x8c   : > { %v529_v2 = vsel %vm528_vm2, %v524_v60, %v1887_v51  ;;  %v530_v5 = vsel %vm528_vm2, %v525_v61, %v1888_v50 }
  0x8d   : > { %v1896_v38 = vpop.permute.xlu1 %1895  ;;  %v725_v6 = vsel %vm523_vm1, %v2165_v4, %v1878_v52  ;;  %v724_v9 = vsel %vm523_vm1, %v2162_v3, %v1877_v54 }
  0x8e   : > { %v2213_v39 = vpop.permute.xlu0 %1890  ;;  %v1898_v62 = vunpack.i.h.bf16 %v1896_v38  ;;  %v1897_v63 = vunpack.i.l.bf16 %v1896_v38 }
  0x8f   : > { %v1893_v7 = vunpack.i.h.bf16 %v2213_v39  ;;  %v1892_v10 = vunpack.i.l.bf16 %v2213_v39 }
  0x90   : > { %v728_v18 = vsel %vm528_vm2, %v724_v9, %v1897_v63  ;;  %v729_v4 = vsel %vm528_vm2, %v725_v6, %v1898_v62 }
  0x91   : > { %v1906_v40 = vpop.permute.xlu1 %1905  ;;  %v727_v3 = vsel %vm523_vm1, %v2157_v1, %v1893_v7  ;;  %v726_v37 = vsel %vm523_vm1, %v2154_v0, %v1892_v10 }
  0x92   : > { %v2215_v41 = vpop.permute.xlu0 %1900  ;;  %v1908_v58 = vunpack.i.h.bf16 %v1906_v40  ;;  %v1907_v59 = vunpack.i.l.bf16 %v1906_v40 }
  0x93   : > { %v1903_v21 = vunpack.i.h.bf16 %v2215_v41  ;;  %v1902_v22 = vunpack.i.l.bf16 %v2215_v41 }
  0x94   : > { %v534_v16 = vsel %vm533_vm3, %v529_v2, %v1907_v59  ;;  %v535_v17 = vsel %vm533_vm3, %v530_v5, %v1908_v58  ;;  %v1645_v58 = vld [vmem:[%s2425_s2] ss:$0 sm:$0xff] }
  0x95   : > { %v1916_v53 = vpop.permute.xlu1 %1915  ;;  %v531_v38 = vsel %vm528_vm2, %v526_v56, %v1902_v22  ;;  %v532_v39 = vsel %vm528_vm2, %v527_v57, %v1903_v21  ;;  %v1646_v59 = vld [vmem:[%s2426_s3] ss:$0 sm:$0xff] }
  0x96   : > { %v1911_v55 = vpop.permute.xlu0 %1910  ;;  %v1918_v14 = vunpack.i.h.bf16 %v1916_v53  ;;  %v1917_v15 = vunpack.i.l.bf16 %v1916_v53 }
  0x97   : > { %v1913_v25 = vunpack.i.h.bf16 %v1911_v55  ;;  %v1912_v26 = vunpack.i.l.bf16 %v1911_v55 }
  0x98   : > { %v732_v32 = vsel %vm533_vm3, %v728_v18, %v1917_v15  ;;  %v733_v33 = vsel %vm533_vm3, %v729_v4, %v1918_v14 }
  0x99   : > { %v1926_v8 = vpop.permute.xlu1 %1925  ;;  %v730_v42 = vsel %vm528_vm2, %v726_v37, %v1912_v26  ;;  %v731_v43 = vsel %vm528_vm2, %v727_v3, %v1913_v25 }
  0x9a   : > { %v1928_v11 = vunpack.i.h.bf16 %v1926_v8  ;;  %v1927_v12 = vunpack.i.l.bf16 %v1926_v8  ;;  %v1921_v13 = vpop.permute.xlu0 %1920 }
  0x9b   : > { %v1923_v1 = vunpack.i.h.bf16 %v1921_v13  ;;  %v1922_v34 = vunpack.i.l.bf16 %v1921_v13 }
  0x9c   : > { %v539_v19 = vsel %vm538_vm4, %v534_v16, %v1927_v12  ;;  %v540_v20 = vsel %vm538_vm4, %v535_v17, %v1928_v11 }
  0x9d   : > { %v1936_v23 = vpop.permute.xlu1 %1935  ;;  %v543_v24 = vpack.c.bf16 %v540_v20, %v539_v19  ;;  %v536_v0 = vsel %vm533_vm3, %v531_v38, %v1922_v34  ;;  %v537_v51 = vsel %vm533_vm3, %v532_v39, %v1923_v1 }
  0x9e   : > { %v1938_v27 = vunpack.i.h.bf16 %v1936_v23  ;;  %v1937_v28 = vunpack.i.l.bf16 %v1936_v23  ;;  %v1931_v29 = vpop.permute.xlu0 %1930 }
  0x9f   : > { %v1933_v30 = vunpack.i.h.bf16 %v1931_v29  ;;  %v1932_v31 = vunpack.i.l.bf16 %v1931_v29  ;;  %1757 = vmatprep.mubr.msk.bf16.mxu0 %vm560_vm5, %v543_v24 }
  0xa0   : > { %v736_v35 = vsel %vm538_vm4, %v732_v32, %v1937_v28  ;;  %v737_v36 = vsel %vm538_vm4, %v733_v33, %v1938_v27 }
  0xa1   : > { %v1946_v40 = vpop.permute.xlu1 %1945  ;;  %v740_v41 = vpack.c.bf16 %v737_v36, %v736_v35  ;;  %v734_v47 = vsel %vm533_vm3, %v730_v42, %v1932_v31  ;;  %v735_v48 = vsel %vm533_vm3, %v731_v43, %v1933_v30 }
  0xa2   : > { %v1948_v44 = vunpack.i.h.bf16 %v1946_v40  ;;  %v1947_v45 = vunpack.i.l.bf16 %v1946_v40  ;;  %v1941_v46 = vpop.permute.xlu0 %1940 }
  0xa3   : > { %v1943_v49 = vunpack.i.h.bf16 %v1941_v46  ;;  %v1942_v50 = vunpack.i.l.bf16 %v1941_v46  ;;  %1767 = vmatprep.mubr.msk.bf16.mxu1 %vm560_vm5, %v740_v41 }
  0xa4   : > { %v738_v52 = vsel %vm538_vm4, %v734_v47, %v1947_v45  ;;  %v739_v53 = vsel %vm538_vm4, %v735_v48, %v1948_v44 }
  0xa5   : > { %v741_v54 = vpack.c.bf16 %v739_v53, %v738_v52  ;;  %v541_v55 = vsel %vm538_vm4, %v536_v0, %v1942_v50  ;;  %v542_v56 = vsel %vm538_vm4, %v537_v51, %v1943_v49 }
  0xa6   : > { %v544_v57 = vpack.c.bf16 %v542_v56, %v541_v55 }
  0xa7   : > { %1768 = vmatmul.mubr.msk.bf16.vlgmr.msra.gmra.mrb[0].mxu1 %vm560_vm5, %v741_v54 }
  0xa8   : > { %1758 = vmatmul.mubr.msk.bf16.vlgmr.msra.gmra.mrb[0].mxu0 %vm560_vm5, %v544_v57 }
 0x17a   : > { %v1769_v60 = vpop.f32.mrb[0].mxu1 }
 0x17b   : > { %v1759_v61 = vpop.f32.mrb[0].mxu0  ;;  %v799_v62 = vmul.f32 %v1769_v60, %v1645_v58  ;;  %v782_v63 = vpop.f32.mrb[1].mxu1 }
 0x17c   : > { %v628_v2 = vmul.f32 %v1759_v61, %v1645_v58  ;;  %v605_v5 = vpop.f32.mrb[1].mxu0  ;;  %v797_v6 = vmul.f32 %v1645_v58, %v782_v63  ;;  %v1770_v7 = vpop.f32.mrb[2].mxu1 }
 0x17d   : > { %v803_v8 = vadd.f32 %v1646_v59, %v799_v62  ;;  %v626_v9 = vmul.f32 %v1645_v58, %v605_v5  ;;  %v1760_v10 = vpop.f32.mrb[2].mxu0  ;;  %v800_v11 = vmul.f32 %v1770_v7, %v1645_v58  ;;  %v785_v12 = vpop.f32.mrb[3].mxu1  ;;  %v2068_v5 = vmov 0.0  }
 0x17e   : > { %v638_v13 = vadd.f32 %v1646_v59, %v628_v2  ;;  %v801_v14 = vadd.f32 %v1646_v59, %v797_v6  ;;  %v629_v15 = vmul.f32 %v1760_v10, %v1645_v58  ;;  %v608_v16 = vpop.f32.mrb[3].mxu0  ;;  %v798_v3 = vmul.f32 %v1645_v58, %v785_v12  ;;  %v2012_v2 = vld [vmem:[%s2427_s4] sm:$0xff]   ;;  %1771 = vmatprep.subr.bf16.mxu0 %v2068_v5 }
 0x17f   : > { %v811_v17 = vmin.f32 %v803_v8, 0.0  ;;  %v636_v18 = vadd.f32 %v1646_v59, %v626_v9  ;;  %v804_v4 = vadd.f32 %v1646_v59, %v800_v11  ;;  %v627_v30 = vmul.f32 %v1645_v58, %v608_v16  ;;  %1781 = vmatprep.subr.bf16.mxu1 %v2068_v5  ;;  %1772 = vmatpush3.bf16.msra.mxu0 %v2012_v2 }
 0x180   : > { %v646_v19 = vmin.f32 %v638_v13, 0.0  ;;  %v809_v20 = vmin.f32 %v801_v14, 0.0  ;;  %v639_v23 = vadd.f32 %v1646_v59, %v629_v15  ;;  %v802_v31 = vadd.f32 %v1646_v59, %v798_v3  ;;  %1782 = vmatpush3.bf16.msra.mxu1 %v2012_v2  ;;  %1773 = vmatprep.subr.bf16.mxu0 %v2068_v5  ;;  %v2014_v15 = vld [vmem:[%s2427_s4 + $0x10] ss:$0 sps:$4 sm:$0xff]   ;;  %v2015_v2 = vld [vmem:[%s2430_s7] sm:$0xff]  }
 0x181   : > { %v817_v21 = vmul.f32 1.442695, %v811_v17  ;;  %v644_v22 = vmin.f32 %v636_v18, 0.0  ;;  %v812_v26 = vmin.f32 %v804_v4, 0.0  ;;  %v637_v33 = vadd.f32 %v1646_v59, %v627_v30  ;;  %1783 = vmatprep.subr.bf16.mxu1 %v2068_v5  ;;  %1777 = vmatprep.mubr.msk.bf16.mxu0 %vm2069_vm15, %v2068_v5 }
 0x182   : > { %v652_v24 = vmul.f32 1.442695, %v646_v19  ;;  %v813_v25 = vmul.f32 1.442695, %v809_v20  ;;  %v647_v28 = vmin.f32 %v639_v23, 0.0  ;;  %v810_v1 = vmin.f32 %v802_v31, 0.0  ;;  %1787 = vmatprep.mubr.msk.bf16.mxu1 %vm2069_vm15, %v2068_v5 }
 0x183   : > { %2028 = vpow2.f32 %v817_v21  ;;  %v648_v27 = vmul.f32 1.442695, %v644_v22  ;;  %v819_v29 = vmul.f32 1.442695, %v812_v26  ;;  %v645_v34 = vmin.f32 %v637_v33, 0.0 }
 0x184   : > { %2030 = vpow2.f32 %v652_v24  ;;  %v654_v32 = vmul.f32 1.442695, %v647_v28  ;;  %v815_v35 = vmul.f32 1.442695, %v810_v1  ;;  %vm807_vm6 = vcmp.gt.f32.partialorder %v803_v8, 0.0 }
 0x185   : > { %2032 = vpow2.f32 %v648_v27  ;;  %v650_v36 = vmul.f32 1.442695, %v645_v34  ;;  %vm642_vm7 = vcmp.gt.f32.partialorder %v638_v13, 0.0  ;;  %vm640_vm8 = vcmp.gt.f32.partialorder %v636_v18, 0.0 }
 0x186   : > { %2034 = vpow2.f32 %v813_v25  ;;  %vm805_vm9 = vcmp.gt.f32.partialorder %v801_v14, 0.0  ;;  %vm643_vm10 = vcmp.gt.f32.partialorder %v639_v23, 0.0  ;;  %vm808_vm11 = vcmp.gt.f32.partialorder %v804_v4, 0.0 }
 0x187   : > { %2036 = vpow2.f32 %v654_v32  ;;  %vm806_vm13 = vcmp.gt.f32.partialorder %v802_v31, 0.0  ;;  %vm641_vm14 = vcmp.gt.f32.partialorder %v637_v33, 0.0  ;;  %v924_v16 = vsel %vm567_vm0, %v2014_v15, 0 }
 0x188   : > { %2038 = vpow2.f32 %v819_v29 }
 0x189   : > { %2040 = vpow2.f32 %v815_v35 }
 0x18a   : > { %2042 = vpow2.f32 %v650_v36 }
 0x18d   : > { %v2029_v37 = vpop.eup %2028 }
 0x18e   : > { %v2031_v38 = vpop.eup %2030  ;;  %v1659_v39 = vadd.f32 -1.0, %v2029_v37 }
 0x18f   : > { %v2033_v40 = vpop.eup %2032  ;;  %v1649_v41 = vadd.f32 -1.0, %v2031_v38 }
 0x190   : > { %v2035_v42 = vpop.eup %2034  ;;  %v827_v43 = vsel %vm807_vm6, %v803_v8, %v1659_v39  ;;  %v1647_v44 = vadd.f32 -1.0, %v2033_v40  ;;  %v2013_v8 = vld [vmem:[%s2427_s4 + $0x8] sm:$0xff]   ;;  %vm1097_vm6 = vcmask 126976  }
 0x191   : > { %v2037_v45 = vpop.eup %2036  ;;  %v662_v46 = vsel %vm642_vm7, %v638_v13, %v1649_v41  ;;  %v1657_v47 = vadd.f32 -1.0, %v2035_v42  ;;  %1774 = vmatpush3.bf16.msra.mxu0 %v2013_v8  ;;  %1784 = vmatpush3.bf16.msra.mxu1 %v2013_v8  ;;  %v1665_v8 = vld [vmem:[%s2428_s5] ss:$0 sm:$0xff]  ;;  %vm1138_vm7 = vcmask 392192  }
 0x192   : > { %v2039_v48 = vpop.eup %2038  ;;  %v831_v49 = vmax.f32 %v662_v46, %v827_v43  ;;  %v660_v50 = vsel %vm640_vm8, %v636_v18, %v1647_v44  ;;  %v1650_v0 = vadd.f32 -1.0, %v2037_v45  ;;  %1775 = vmatprep.subr.bf16.mxu0 %v2068_v5  ;;  %1785 = vmatprep.subr.bf16.mxu1 %v2068_v5  ;;  %vm1140_vm8 = vcmask 523264  }
 0x193   : > { %v825_v51 = vsel %vm805_vm9, %v801_v14, %v1657_v47  ;;  %v1660_v52 = vadd.f32 -1.0, %v2039_v48  ;;  %v2041_v53 = vpop.eup %2040  ;;  %vm1173_vm9 = vcmask 654336  }
 0x194   : > { %835 = vst.msk [vmem:[#allocation2 + $0x10] sm:$0xff] %vm523_vm1, %v831_v49  ;;  %v829_v54 = vmax.f32 %v660_v50, %v825_v51  ;;  %v663_v55 = vsel %vm643_vm10, %v639_v23, %v1650_v0  ;;  %v1658_v57 = vadd.f32 -1.0, %v2041_v53  ;;  %v2043_v58 = vpop.eup %2042 }
 0x195   : > { %v828_v56 = vsel %vm808_vm11, %v804_v4, %v1660_v52  ;;  %v1648_v60 = vadd.f32 -1.0, %v2043_v58  ;;  %1776 = vmatpush3.bf16.msra.mxu0 %v924_v16  ;;  %1786 = vmatpush3.bf16.msra.mxu1 %v924_v16  ;;  %vm1309_vm11 = vcmask 257024  }
 0x196   : > { %833 = vst.msk [vmem:[#allocation2] sm:$0xff] %vm523_vm1, %v829_v54  ;;  %v832_v59 = vmax.f32 %v663_v55, %v828_v56  ;;  %v826_v61 = vsel %vm806_vm13, %v802_v31, %v1658_v57  ;;  %1791 = vmatprep.subr.bf16.mxu0 %v2068_v5  ;;  %1805 = vmatprep.subr.bf16.mxu1 %v2068_v5 }
 0x197   : > { %v661_v62 = vsel %vm641_vm14, %v637_v33, %v1648_v60 }
 0x198   : > { %837 = vst.msk [vmem:[#allocation2 + $0x18] sm:$0x3f] %vm836_vm12, %v832_v59  ;;  %v830_v63 = vmax.f32 %v661_v62, %v826_v61 }
 0x19a   : > { %834 = vst.msk [vmem:[#allocation2 + $0x8] sm:$0xff] %vm523_vm1, %v830_v63 }
 0x19f   : > { %v855_v6 = vld [vmem:[#allocation2 + $0x12] ss:$2 sm:$0x1f]  ;;  %v851_v7 = vld [vmem:[#allocation2 + $0x11] ss:$2 sm:$0x1f] }
 0x1a0   : > { %v859_v13 = vld [vmem:[#allocation2 + $0x13] ss:$2 sm:$0x1f]  ;;  %v863_v4 = vld [vmem:[#allocation2 + $0x14] ss:$2 sm:$0x1f] }
 0x1a1   : > { %v853_v9 = vld [vmem:[#allocation2 + $0x2] ss:$2 sm:$0xff]  ;;  %v849_v10 = vld [vmem:[#allocation2 + $0x1] ss:$2 sm:$0xff] }
 0x1a2   : > { %v1954_v11 = vpack.i.bf16 %v855_v6, %v853_v9  ;;  %v1949_v12 = vpack.i.bf16 %v851_v7, %v849_v10  ;;  %v857_v14 = vld [vmem:[#allocation2 + $0x3] ss:$2 sm:$0xff]  ;;  %v861_v18 = vld [vmem:[#allocation2 + $0x4] ss:$2 sm:$0xff]  ;;  %v1666_v9 = vld [vmem:[%s2429_s6] ss:$0 sm:$0xff] }
 0x1a3   : > { %v1964_v17 = vpack.i.bf16 %v859_v13, %v857_v14  ;;  %v1974_v19 = vpack.i.bf16 %v863_v4, %v861_v18  ;;  %v996_v20 = vld [vmem:[#allocation2 + $0x5] ss:$2 sm:$0xff]  ;;  %v998_v3 = vld [vmem:[#allocation2 + $0x15] ss:$2 sm:$0x1f] }
 0x1a4   : > { %1955 = vrot.lane.b32.xlu1 %v1954_v11, %s2064_s28  ;;  %1950 = vrot.lane.b32.xlu0 %v1949_v12, %s2064_s28  ;;  %v1984_v21 = vpack.i.bf16 %v998_v3, %v996_v20  ;;  %v847_v35 = vld [vmem:[#allocation2 + $0x10] ss:$2 sm:$0x1f]  ;;  %v845_v36 = vld [vmem:[#allocation2] ss:$2 sm:$0xff]  ;;  %s2070_s28 = smov 64  }
 0x1a5   : > { %v2016_v6 = vld [vmem:[%s2430_s7 + $0x8] sm:$0xff]  }
 0x1a8   : > { %1965 = vrot.lane.b32.xlu1 %v1964_v17, %s2065_s29  ;;  %1960 = vrot.lane.b32.xlu0 %v1954_v11, %s2065_s29 }
 0x1ac   : > { %1975 = vrot.lane.b32.xlu1 %v1974_v19, %s2066_s16  ;;  %1970 = vrot.lane.b32.xlu0 %v1964_v17, %s2066_s16  ;;  %s2071_s16 = smov 48  }
 0x1b0   : > { %1985 = vrot.lane.b32.xlu1 %v1984_v21, %s2067_s19  ;;  %1980 = vrot.lane.b32.xlu0 %v1974_v19, %s2067_s19 }
 0x216   : > { %v1956_v22 = vpop.permute.xlu1 %1955  ;;  %v1951_v23 = vpop.permute.xlu0 %1950 }
 0x217   : > { %v1958_v26 = vunpack.i.h.bf16 %v1956_v22  ;;  %v1957_v27 = vunpack.i.l.bf16 %v1956_v22  ;;  %v1953_v28 = vunpack.i.h.bf16 %v1951_v23  ;;  %v1952_v29 = vunpack.i.l.bf16 %v1951_v23 }
 0x219   : > { %v1026_v41 = vsel %vm523_vm1, %v851_v7, %v1958_v26  ;;  %v1025_v42 = vsel %vm523_vm1, %v849_v10, %v1957_v27  ;;  %v897_v43 = vsel %vm523_vm1, %v847_v35, %v1953_v28  ;;  %v896_v44 = vsel %vm523_vm1, %v845_v36, %v1952_v29  ;;  %v2017_v7 = vld [vmem:[%s2430_s7 + $0x10] sm:$0xff]  }
 0x21a   : > { %v1966_v24 = vpop.permute.xlu1 %1965  ;;  %v1961_v25 = vpop.permute.xlu0 %1960 }
 0x21b   : > { %v1968_v30 = vunpack.i.h.bf16 %v1966_v24  ;;  %v1967_v31 = vunpack.i.l.bf16 %v1966_v24  ;;  %v1963_v32 = vunpack.i.h.bf16 %v1961_v25  ;;  %v1962_v33 = vunpack.i.l.bf16 %v1961_v25 }
 0x21d   : > { %v1027_v45 = vsel %vm528_vm2, %v1025_v42, %v1967_v31  ;;  %v1028_v46 = vsel %vm528_vm2, %v1026_v41, %v1968_v30  ;;  %v898_v47 = vsel %vm528_vm2, %v896_v44, %v1962_v33  ;;  %v899_v48 = vsel %vm528_vm2, %v897_v43, %v1963_v32 }
 0x21e   : > { %v1976_v1 = vpop.permute.xlu1 %1975  ;;  %v1971_v34 = vpop.permute.xlu0 %1970 }
 0x21f   : > { %v1978_v37 = vunpack.i.h.bf16 %v1976_v1  ;;  %v1977_v38 = vunpack.i.l.bf16 %v1976_v1  ;;  %v1973_v39 = vunpack.i.h.bf16 %v1971_v34  ;;  %v1972_v40 = vunpack.i.l.bf16 %v1971_v34 }
 0x221   : > { %v1029_v54 = vsel %vm533_vm3, %v1027_v45, %v1977_v38  ;;  %v1030_v55 = vsel %vm533_vm3, %v1028_v46, %v1978_v37  ;;  %v900_v56 = vsel %vm533_vm3, %v898_v47, %v1972_v40  ;;  %v901_v57 = vsel %vm533_vm3, %v899_v48, %v1973_v39  ;;  %v2018_v45 = vld [vmem:[%s2430_s7 + $0x18] sm:$0xff]   ;;  %v2019_v46 = vld [vmem:[%s2430_s7 + $0x20] sm:$0xff]  }
 0x222   : > { %v1986_v49 = vpop.permute.xlu1 %1985  ;;  %v1981_v50 = vpop.permute.xlu0 %1980 }
 0x223   : > { %v1988_v0 = vunpack.i.h.bf16 %v1986_v49  ;;  %v1987_v51 = vunpack.i.l.bf16 %v1986_v49  ;;  %v1983_v52 = vunpack.i.h.bf16 %v1981_v50  ;;  %v1982_v53 = vunpack.i.l.bf16 %v1981_v50 }
 0x225   : > { %v1031_v58 = vsel %vm538_vm4, %v1029_v54, %v1987_v51  ;;  %v1032_v59 = vsel %vm538_vm4, %v1030_v55, %v1988_v0  ;;  %v902_v60 = vsel %vm538_vm4, %v900_v56, %v1982_v53  ;;  %v903_v61 = vsel %vm538_vm4, %v901_v57, %v1983_v52 }
 0x226   : > { %v1033_v62 = vpack.c.bf16 %v1032_v59, %v1031_v58  ;;  %v904_v63 = vpack.c.bf16 %v903_v61, %v902_v60 }
 0x228   : > { %1778 = vmatmul.mubr.msk.bf16.vlgmr.msra.gmra.mrb[4].mxu0 %vm560_vm5, %v904_v63  ;;  %1788 = vmatmul.mubr.msk.bf16.vlgmr.msra.gmra.mrb[4].mxu1 %vm560_vm5, %v1033_v62 }
 0x229   : > { %1801 = vmatprep.mubr.msk.bf16.mxu0 %vm2069_vm15, %v2068_v5  ;;  %1815 = vmatprep.mubr.msk.bf16.mxu1 %vm2069_vm15, %v2068_v5 }
 0x22a   : > { %1792 = vmatpush3.bf16.msra.mxu0 %v2015_v2  ;;  %1806 = vmatpush3.bf16.msra.mxu1 %v2015_v2 }
 0x22b   : > { %1793 = vmatprep.subr.bf16.mxu0 %v2068_v5  ;;  %1807 = vmatprep.subr.bf16.mxu1 %v2068_v5 }
 0x22e   : > { %1794 = vmatpush3.bf16.msra.mxu0 %v2016_v6  ;;  %1808 = vmatpush3.bf16.msra.mxu1 %v2016_v6 }
 0x22f   : > { %1795 = vmatprep.subr.bf16.mxu0 %v2068_v5  ;;  %1809 = vmatprep.subr.bf16.mxu1 %v2068_v5 }
 0x232   : > { %1796 = vmatpush3.bf16.msra.mxu0 %v2017_v7  ;;  %1810 = vmatpush3.bf16.msra.mxu1 %v2017_v7 }
 0x233   : > { %1797 = vmatprep.subr.bf16.mxu0 %v2068_v5  ;;  %1811 = vmatprep.subr.bf16.mxu1 %v2068_v5 }
 0x236   : > { %1798 = vmatpush3.bf16.msra.mxu0 %v2018_v45  ;;  %1812 = vmatpush3.bf16.msra.mxu1 %v2018_v45  ;;  %v2024_v45 = vld [vmem:[%s2433_s10 + $0x20] sm:$0xff]  }
 0x237   : > { %1799 = vmatprep.subr.bf16.mxu0 %v2068_v5  ;;  %1813 = vmatprep.subr.bf16.mxu1 %v2068_v5 }
 0x23a   : > { %1800 = vmatpush3.bf16.msra.mxu0 %v2019_v46  ;;  %1814 = vmatpush3.bf16.msra.mxu1 %v2019_v46  ;;  %v2025_v46 = vld [vmem:[%s2433_s10 + $0x30] sm:$0xff]  }
 0x23b   : > { %1819 = vmatprep.subr.bf16.mxu0 %v2068_v5  ;;  %1827 = vmatprep.subr.bf16.mxu1 %v2068_v5 }
 0x2fb   : > { %v960_v10 = vpop.f32.mrb[4].mxu0  ;;  %v1071_v11 = vpop.f32.mrb[4].mxu1 }
 0x2fc   : > { %v973_v12 = vmul.f32 %v1665_v8, %v960_v10  ;;  %v1078_v13 = vmul.f32 %v1665_v8, %v1071_v11  ;;  %v1779_v14 = vpop.f32.mrb[5].mxu0  ;;  %v1789_v15 = vpop.f32.mrb[5].mxu1 }
 0x2fd   : > { %v963_v16 = vpop.f32.mrb[6].mxu0  ;;  %v1074_v17 = vpop.f32.mrb[6].mxu1 }
 0x2fe   : > { %v981_v18 = vadd.f32 %v1666_v9, %v973_v12  ;;  %v1080_v4 = vadd.f32 %v1666_v9, %v1078_v13  ;;  %v974_v19 = vmul.f32 %v1665_v8, %v963_v16  ;;  %v1079_v20 = vmul.f32 %v1665_v8, %v1074_v17  ;;  %v1780_v3 = vpop.f32.mrb[7].mxu0  ;;  %v1790_v21 = vpop.f32.mrb[7].mxu1 }
 0x2ff   : > { %v2023_v3 = vld [vmem:[%s2433_s10 + $0x8] sm:$0xff]   ;;  %v1678_v21 = vld [vmem:[%s2431_s8] ss:$0 sm:$0xff] }
 0x300   : > { %v985_v22 = vmin.f32 %v981_v18, 0.0  ;;  %v1084_v23 = vmin.f32 %v1080_v4, 0.0  ;;  %v982_v24 = vadd.f32 %v1666_v9, %v974_v19  ;;  %v1081_v25 = vadd.f32 %v1666_v9, %v1079_v20  ;;  %v2021_v19 = vld [vmem:[%s2433_s10] sm:$0xff]   ;;  %v2022_v20 = vld [vmem:[%s2433_s10 + $0x18] sm:$0xff]  }
 0x301   : > { %vm983_vm0 = vcmp.gt.f32.partialorder %v981_v18, 0.0  ;;  %vm1082_vm1 = vcmp.gt.f32.partialorder %v1080_v4, 0.0 }
 0x302   : > { %v987_v26 = vmul.f32 1.442695, %v985_v22  ;;  %v1086_v27 = vmul.f32 1.442695, %v1084_v23  ;;  %v986_v28 = vmin.f32 %v982_v24, 0.0  ;;  %v1085_v29 = vmin.f32 %v1081_v25, 0.0 }
 0x303   : > { %vm984_vm3 = vcmp.gt.f32.partialorder %v982_v24, 0.0  ;;  %vm1083_vm5 = vcmp.gt.f32.partialorder %v1081_v25, 0.0  ;;  %v1679_v22 = vld [vmem:[%s2432_s9] ss:$0 sm:$0xff] }
 0x304   : > { %2044 = vpow2.f32 %v987_v26  ;;  %v989_v30 = vmul.f32 1.442695, %v986_v28  ;;  %v1088_v31 = vmul.f32 1.442695, %v1085_v29 }
 0x305   : > { %2046 = vpow2.f32 %v1086_v27 }
 0x306   : > { %2048 = vpow2.f32 %v989_v30 }
 0x307   : > { %2050 = vpow2.f32 %v1088_v31 }
 0x30e   : > { %v2045_v32 = vpop.eup %2044 }
 0x30f   : > { %v2047_v33 = vpop.eup %2046  ;;  %v1667_v1 = vadd.f32 -1.0, %v2045_v32 }
 0x310   : > { %v1670_v34 = vadd.f32 -1.0, %v2047_v33  ;;  %v2049_v35 = vpop.eup %2048 }
 0x311   : > { %v993_v36 = vsel %vm983_vm0, %v981_v18, %v1667_v1  ;;  %v2051_v37 = vpop.eup %2050  ;;  %v1668_v39 = vadd.f32 -1.0, %v2049_v35 }
 0x312   : > { %v1092_v38 = vsel %vm1082_vm1, %v1080_v4, %v1670_v34  ;;  %v1671_v41 = vadd.f32 -1.0, %v2051_v37  ;;  %v2020_v4 = vld [vmem:[%s2433_s10 + $0x10] sm:$0xff]  }
 0x313   : > { %v1094_v40 = vmax.f32 %v993_v36, %v1092_v38  ;;  %v994_v42 = vsel %vm984_vm3, %v982_v24, %v1668_v39 }
 0x314   : > { %v1093_v43 = vsel %vm1083_vm5, %v1081_v25, %v1671_v41 }
 0x315   : > { %1096 = vst.msk [vmem:[#allocation3] sm:$0xff] %vm528_vm2, %v1094_v40  ;;  %v1095_v44 = vmax.f32 %v994_v42, %v1093_v43 }
 0x317   : > { %1098 = vst.msk [vmem:[#allocation3 + $0x8] sm:$0x1f] %vm1097_vm6, %v1095_v44 }
 0x31c   : > { %v1113_v47 = vld [vmem:[#allocation3 + $0x1] ss:$2 sm:$0xf]  ;;  %v1111_v61 = vld [vmem:[#allocation3] ss:$2 sm:$0xf] }
 0x31e   : > { %v1115_v48 = vld [vmem:[#allocation3 + $0x2] ss:$2 sm:$0xf]  ;;  %v1117_v49 = vld [vmem:[#allocation3 + $0x3] ss:$2 sm:$0xf] }
 0x31f   : > { %v1994_v50 = vpack.i.bf16 %v1117_v49, %v1115_v48  ;;  %v1989_v0 = vpack.i.bf16 %v1115_v48, %v1113_v47  ;;  %v1119_v51 = vld [vmem:[#allocation3 + $0x4] ss:$2 sm:$0xf]  ;;  %v1238_v52 = vld [vmem:[#allocation3 + $0x5] ss:$2 sm:$0xf] }
 0x320   : > { %v2004_v53 = vpack.i.bf16 %v1238_v52, %v1119_v51  ;;  %v1999_v54 = vpack.i.bf16 %v1119_v51, %v1117_v49  ;;  %v2027_v51 = vld [vmem:[%s2433_s10 + $0x38] sm:$0xff]  }
 0x321   : > { %1995 = vrot.lane.b32.xlu1 %v1994_v50, %s2067_s19  ;;  %1990 = vrot.lane.b32.xlu0 %v1989_v0, %s2065_s29  ;;  %v2026_v0 = vld [vmem:[%s2433_s10 + $0x28] sm:$0xff]  }
 0x325   : > { %2005 = vrot.lane.b32.xlu1 %v2004_v53, %s2070_s28  ;;  %2000 = vrot.lane.b32.xlu0 %v1999_v54, %s2071_s16 }
 0x393   : > { %v1996_v55 = vpop.permute.xlu1 %1995  ;;  %v1991_v56 = vpop.permute.xlu0 %1990 }
 0x394   : > { %v1993_v57 = vunpack.i.h.bf16 %v1991_v56  ;;  %v1992_v58 = vunpack.i.l.bf16 %v1991_v56  ;;  %v1998_v59 = vunpack.i.h.bf16 %v1996_v55  ;;  %v1997_v60 = vunpack.i.l.bf16 %v1996_v55 }
 0x396   : > { %v1252_v62 = vsel %vm528_vm2, %v1113_v47, %v1993_v57  ;;  %v1136_v63 = vsel %vm528_vm2, %v1111_v61, %v1992_v58 }
 0x397   : > { %v2006_v2 = vpop.permute.xlu1 %2005  ;;  %v2001_v6 = vpop.permute.xlu0 %2000  ;;  %v1137_v11 = vsel %vm538_vm4, %v1136_v63, %v1997_v60  ;;  %v1253_v12 = vsel %vm538_vm4, %v1252_v62, %v1998_v59 }
 0x398   : > { %v2008_v7 = vunpack.i.h.bf16 %v2006_v2  ;;  %v2007_v8 = vunpack.i.l.bf16 %v2006_v2  ;;  %v2003_v9 = vunpack.i.h.bf16 %v2001_v6  ;;  %v2002_v10 = vunpack.i.l.bf16 %v2001_v6 }
 0x39a   : > { %v1139_v13 = vsel %vm1138_vm7, %v1137_v11, %v2002_v10  ;;  %v1254_v14 = vsel %vm1138_vm7, %v1253_v12, %v2003_v9  ;;  %v1563_v10 = vld [vmem:[%s2434_s11] sm:$0x1] }
 0x39b   : > { %v1141_v15 = vsel %vm1140_vm8, %v1139_v13, %v2007_v8  ;;  %v1255_v16 = vsel %vm1140_vm8, %v1254_v14, %v2008_v7 }
 0x39c   : > { %v1142_v17 = vpack.c.bf16 %v1141_v15, %v1141_v15  ;;  %v1256_v18 = vpack.c.bf16 %v1255_v16, %v1255_v16 }
 0x39e   : > { %1802 = vmatmul.mubr.msk.bf16.vlgmr.msra.gmra.mrb[8].mxu0 %vm1173_vm9, %v1142_v17  ;;  %1816 = vmatmul.mubr.msk.bf16.vlgmr.msra.gmra.mrb[8].mxu1 %vm1173_vm9, %v1256_v18 }
 0x39f   : > { %1823 = vmatprep.mubr.msk.bf16.mxu0 %vm2069_vm15, %v2068_v5  ;;  %1831 = vmatprep.mubr.msk.bf16.mxu1 %vm2069_vm15, %v2068_v5 }
 0x3a0   : > { %1820 = vmatpush3.bf16.msra.mxu0 %v2020_v4  ;;  %1828 = vmatpush3.bf16.msra.mxu1 %v2021_v19 }
 0x3a1   : > { %1821 = vmatprep.subr.bf16.mxu0 %v2068_v5  ;;  %1829 = vmatprep.subr.bf16.mxu1 %v2068_v5 }
 0x3a4   : > { %1822 = vmatpush3.bf16.msra.mxu0 %v2022_v20  ;;  %1830 = vmatpush3.bf16.msra.mxu1 %v2023_v3 }
 0x3a5   : > { %1835 = vmatprep.subr.bf16.mxu0 %v2068_v5  ;;  %1843 = vmatprep.subr.bf16.mxu1 %v2068_v5 }
 0x471   : > { %v1211_v23 = vpop.f32.mrb[8].mxu0  ;;  %v1294_v24 = vpop.f32.mrb[8].mxu1 }
 0x472   : > { %v1223_v25 = vmul.f32 %v1678_v21, %v1211_v23  ;;  %v1300_v26 = vmul.f32 %v1678_v21, %v1294_v24  ;;  %v1803_v27 = vpop.f32.mrb[9].mxu0  ;;  %v1817_v28 = vpop.f32.mrb[9].mxu1 }
 0x473   : > { %v1214_v29 = vpop.f32.mrb[10].mxu0  ;;  %v1297_v30 = vpop.f32.mrb[10].mxu1 }
 0x474   : > { %v1230_v31 = vadd.f32 %v1679_v22, %v1223_v25  ;;  %v1301_v32 = vadd.f32 %v1679_v22, %v1300_v26  ;;  %v1804_v33 = vpop.f32.mrb[11].mxu0  ;;  %v1818_v1 = vpop.f32.mrb[11].mxu1 }
 0x476   : > { %v1232_v34 = vmin.f32 %v1230_v31, 0.0  ;;  %v1303_v35 = vmin.f32 %v1301_v32, 0.0  ;;  %vm1231_vm2 = vcmp.gt.f32.partialorder %v1230_v31, 0.0  ;;  %vm1302_vm10 = vcmp.gt.f32.partialorder %v1301_v32, 0.0 }
 0x478   : > { %v1233_v36 = vmul.f32 1.442695, %v1232_v34  ;;  %v1304_v37 = vmul.f32 1.442695, %v1303_v35 }
 0x47a   : > { %2052 = vpow2.f32 %v1233_v36 }
 0x47b   : > { %2054 = vpow2.f32 %v1304_v37 }
 0x484   : > { %v2053_v38 = vpop.eup %2052 }
 0x485   : > { %v2055_v39 = vpop.eup %2054  ;;  %v1680_v40 = vadd.f32 -1.0, %v2053_v38 }
 0x486   : > { %v1682_v41 = vadd.f32 -1.0, %v2055_v39 }
 0x487   : > { %v1236_v42 = vsel %vm1231_vm2, %v1230_v31, %v1680_v40 }
 0x488   : > { %v1307_v43 = vsel %vm1302_vm10, %v1301_v32, %v1682_v41 }
 0x489   : > { %v1308_v44 = vmax.f32 %v1236_v42, %v1307_v43 }
 0x48b   : > { %1310 = vst.msk [vmem:[#allocation4] sm:$0xf] %vm1309_vm11, %v1308_v44 }
 0x492   : > { %v1318_v47 = vld [vmem:[#allocation4 + $0x1] ss:$8 sm:$0x1]  ;;  %v1311_v48 = vld [vmem:[#allocation4] ss:$8 sm:$0x1] }
 0x493   : > { %v1319_v49 = vpack.c.bf16 %v1318_v47, %v1318_v47  ;;  %v1312_v50 = vpack.c.bf16 %v1311_v48, %v1311_v48  ;;  %v1436_v52 = vld [vmem:[#allocation4 + $0x2] ss:$8 sm:$0x1]  ;;  %v1500_v53 = vld [vmem:[#allocation4 + $0x3] ss:$8 sm:$0x1] }
 0x494   : > { %v1437_v54 = vpack.c.bf16 %v1436_v52, %v1436_v52  ;;  %v1501_v55 = vpack.c.bf16 %v1500_v53, %v1500_v53 }
 0x495   : > { %1824 = vmatmul.mubr.msk.bf16.vlgmr.msra.gmra.mrb[12].mxu0 %vm538_vm4, %v1319_v49  ;;  %1832 = vmatmul.mubr.msk.bf16.vlgmr.msra.gmra.mrb[12].mxu1 %vm538_vm4, %v1312_v50 }
 0x496   : > { %1836 = vmatpush3.bf16.msra.mxu0 %v2024_v45  ;;  %1844 = vmatpush3.bf16.msra.mxu1 %v2025_v46 }
 0x497   : > { %1837 = vmatprep.subr.bf16.mxu0 %v2068_v5  ;;  %1845 = vmatprep.subr.bf16.mxu1 %v2068_v5 }
 0x498   : > { %1839 = vmatprep.mubr.msk.bf16.mxu0 %vm2069_vm15, %v2068_v5  ;;  %1847 = vmatprep.mubr.msk.bf16.mxu1 %vm2069_vm15, %v2068_v5 }
 0x49a   : > { %1838 = vmatpush3.bf16.msra.mxu0 %v2026_v0  ;;  %1846 = vmatpush3.bf16.msra.mxu1 %v2027_v51 }
 0x49d   : > { %1840 = vmatmul.mubr.msk.bf16.vlgmr.msra.gmra.mrb[16].mxu0 %vm538_vm4, %v1437_v54  ;;  %1848 = vmatmul.mubr.msk.bf16.vlgmr.msra.gmra.mrb[16].mxu1 %vm538_vm4, %v1501_v55  ;;  %vm1565_vm4 = vcmask 16384  }
 0x568   : > { %v1374_v56 = vpop.f32.mrb[12].mxu0  ;;  %v1429_v57 = vpop.f32.mrb[12].mxu1 }
 0x569   : > { %v1430_v58 = vadd.f32 %v1429_v57, %v1374_v56  ;;  %v1825_v59 = vpop.f32.mrb[13].mxu0  ;;  %v1833_v60 = vpop.f32.mrb[13].mxu1 }
 0x56a   : > { %v1377_v61 = vpop.f32.mrb[14].mxu0  ;;  %v1432_v62 = vpop.f32.mrb[14].mxu1 }
 0x56b   : > { %v1826_v5 = vpop.f32.mrb[15].mxu0  ;;  %v1834_v63 = vpop.f32.mrb[15].mxu1 }
 0x570   : > { %v1492_v2 = vpop.f32.mrb[16].mxu0  ;;  %v1556_v6 = vpop.f32.mrb[16].mxu1 }
 0x571   : > { %v1498_v7 = vadd.f32 %v1492_v2, %v1430_v58  ;;  %v1841_v8 = vpop.f32.mrb[17].mxu0  ;;  %v1849_v9 = vpop.f32.mrb[17].mxu1 }
 0x572   : > { %v1495_v11 = vpop.f32.mrb[18].mxu0  ;;  %v1559_v12 = vpop.f32.mrb[18].mxu1 }
 0x573   : > { %v1562_v13 = vadd.f32 %v1556_v6, %v1498_v7  ;;  %v1842_v14 = vpop.f32.mrb[19].mxu0  ;;  %v1850_v15 = vpop.f32.mrb[19].mxu1 }
 0x575   : > { %v1564_v16 = vadd.f32 %v1563_v10, %v1562_v13 }
 0x577   : > { %1566 = vst.msk [vmem:[%s411_s26] sm:$0x1] %vm1565_vm4, %v1564_v16 }
 0x578 PF: > { %s22_s21 = sadd.s32 1, %s2062_s21  }
 0x579   : > { %p19_p5 = scmp.ge.s32.totalorder %s22_s21, 4  }
 0x57b   :  { %21 = sbr.rel (!%p19_p5) target bundleno = 1 (0x1), region = 143 }

</bundles_post_ra>
